<compile_context>
chip_gen: v5e
topology: v5e:2x2
jax: 0.10.0
libtpu: 0.0.40
codegen_flags: <defaults>
</compile_context>

<pallas_src>
import functools

import numpy as np
import jax
import jax.numpy as jnp
from jax.experimental import pallas as pl
from jax.experimental.pallas import tpu as pltpu


# --------------------------------------------------------------------------
# The fused Classifier7 forward kernel (single invocation, everything in VMEM)
# --------------------------------------------------------------------------
def _classifier7_kernel(
    # graph inputs
    xpad_ref, adj_ref,
    # BN_embedding parameters
    conv_w_ref, conv_b_ref, bn1_scale_ref, bn1_shift_ref,
    gcn_w_ref, gcn_b_ref, press_m_ref, bn2_scale_ref, bn2_shift_ref,
    # Presentation parameters
    jk_w0_ref, jk_w1_ref, jk_w2_ref, jk_b0_ref, jk_b1_ref, jk_b2_ref,
    bn3_s0_ref, bn3_s1_ref, bn3_s2_ref,
    fc1t_0_ref, fc1t_1_ref, fc1t_2_ref, fc1_const_ref,
    fc2t_ref, fc2_b_ref,
    # outputs
    emd_ref, logits_ref,
    *, pip, n_nodes):
  """Whole Classifier7 forward, fused into one VMEM-resident kernel."""
  N = n_nodes
  f32 = jnp.float32

  xp = xpad_ref[...]                     # (N + 2*pip, 128); rows [pip, pip+N) = real nodes
  adj = adj_ref[...]                     # (N, N), adj[v, u] = weight of edge u -> v
  x_c = xp[pip:pip + N, :]               # centre tap

  # ---- dilated Conv1d over the node axis (im2col == 3 shifted matmuls) ----
  h0 = []
  for i in range(pip):
    d = i + 1
    x_m = xp[pip - d:pip - d + N, :]     # x[t - d]  (zero padded)
    x_p = xp[pip + d:pip + d + N, :]     # x[t + d]  (zero padded)
    acc = jnp.dot(x_m, conv_w_ref[3 * i + 0], preferred_element_type=f32)
    acc = acc + jnp.dot(x_c, conv_w_ref[3 * i + 1], preferred_element_type=f32)
    acc = acc + jnp.dot(x_p, conv_w_ref[3 * i + 2], preferred_element_type=f32)
    h0.append(acc + conv_b_ref[i])       # (N, 96)

  # ---- cross_connect + BatchNorm1 + GraphConv + ReLU ----
  scale1 = bn1_scale_ref[...]
  shift1 = bn1_shift_ref[...]
  h2 = []
  for i in range(pip):
    h1 = (jnp.maximum(h0[i % pip], 0.0) + h0[(i + 1) % pip]) * scale1 + shift1
    hw = jnp.dot(h1, gcn_w_ref[i], preferred_element_type=f32)          # H @ W
    g = jnp.dot(adj, hw, preferred_element_type=f32) + gcn_b_ref[i]     # A @ (HW) + b
    h2.append(jnp.maximum(g, 0.0))                                      # (N, 54)

  # ---- pressConv ('same' Conv1d over the 54-channel axis) as a banded matmul,
  #      conv bias + BatchNorm2 folded into bn2_scale / bn2_shift ----
  press = jnp.dot(h2[0], press_m_ref[0], preferred_element_type=f32)
  for c in range(1, pip):
    press = press + jnp.dot(h2[c], press_m_ref[c], preferred_element_type=f32)
  emd = press * bn2_scale_ref[...] + bn2_shift_ref[...]                 # (N, 54)
  emd_ref[...] = emd
  # TODO(synk): nn.Dropout is identity in eval mode (no RNG dropout in-kernel).

  # ---- Presentation: 3x (GraphConv + ReLU); readout-sum + BN3 + fc1 + fc2
  #      folded into a per-node accumulation and one row-reduce epilogue ----
  fc1_out = fc1t_0_ref.shape[-1]
  jk_stage = ((jk_w0_ref, jk_b0_ref, bn3_s0_ref, fc1t_0_ref),
              (jk_w1_ref, jk_b1_ref, bn3_s1_ref, fc1t_1_ref),
              (jk_w2_ref, jk_b2_ref, bn3_s2_ref, fc1t_2_ref))
  h = emd
  z_nodes = jnp.zeros((N, fc1_out), f32)
  for w_ref, b_ref, s_ref, fw_ref in jk_stage:
    hw = jnp.dot(h, w_ref[...], preferred_element_type=f32)
    h = jnp.maximum(jnp.dot(adj, hw, preferred_element_type=f32) + b_ref[...], 0.0)
    # (sum_n h[n] * bn3_scale) @ fc1_block  ==  sum_n (h[n] * bn3_scale) @ fc1_block
    z_nodes = z_nodes + jnp.dot(h * s_ref[...], fw_ref[...], preferred_element_type=f32)

  # Spread the constant term (bn3_shift @ fc1.T + fc1_bias) over the N rows so
  # the node-sum readout recovers it exactly, apply fc2 per node, then reduce.
  z_nodes = z_nodes + fc1_const_ref[...] * (1.0 / N)
  out_nodes = jnp.dot(z_nodes, fc2t_ref[...], preferred_element_type=f32)   # (N, n_classes)
  logits_ref[...] = jnp.sum(out_nodes, axis=0, keepdims=True) + fc2_b_ref[...]


# --------------------------------------------------------------------------
# Host-side wrapper (one small pad for the node features, single pallas_call)
# --------------------------------------------------------------------------
@jax.jit
def _forward_impl(node_feats, adj, wargs):
  pip = wargs[4].shape[0]          # gcn_w: (pip, 96, 54)
  emd_dim = wargs[6].shape[-1]     # press_m: (pip, 54, 54)
  n_classes = wargs[-1].shape[-1]  # fc2_b: (1, n_classes)
  N, F = node_feats.shape

  # zero rows above/below so each dilation tap is a static in-kernel slice
  xpad = jnp.zeros((N + 2 * pip, F), jnp.float32)
  xpad = xpad.at[pip:pip + N, :].set(node_feats.astype(jnp.float32))

  n_inputs = 2 + len(wargs)
  emd, logits = pl.pallas_call(
      functools.partial(_classifier7_kernel, pip=pip, n_nodes=N),
      out_shape=(jax.ShapeDtypeStruct((N, emd_dim), jnp.float32),
                 jax.ShapeDtypeStruct((1, n_classes), jnp.float32)),
      in_specs=[pl.BlockSpec(memory_space=pltpu.MemorySpace.VMEM)] * n_inputs,
      out_specs=(pl.BlockSpec(memory_space=pltpu.MemorySpace.VMEM),
                 pl.BlockSpec(memory_space=pltpu.MemorySpace.VMEM)),
  )(xpad, adj.astype(jnp.float32), *wargs)
  return logits, emd


def classifier7_forward(prep, node_feats, adj):
  return _forward_impl(node_feats, adj, prep['args'])


# --------------------------------------------------------------------------
# One-time parameter preparation (constant weight repacking / BN folding)
# --------------------------------------------------------------------------
def bn_scale_shift(bn_params, eps=1e-5):
  gamma, beta, mean, var = bn_params
  scale = gamma / jnp.sqrt(var + eps)
  shift = beta - mean * scale
  return scale, shift


def prepare_params(P):
  pip = len(P['conv_w'])
  f32 = jnp.float32

  # conv taps:  W_j[c, o] = conv_w[o, c, j]   (j = 0: x[t-d], 1: x[t], 2: x[t+d])
  conv_w = jnp.stack([jnp.transpose(w, (2, 1, 0)) for w in P['conv_w']], 0)
  conv_w = conv_w.reshape(pip * 3, conv_w.shape[-2], conv_w.shape[-1]).astype(f32)
  conv_b = jnp.stack(P['conv_b'], 0)[:, None, :].astype(f32)            # (pip, 1, 96)

  s1, t1 = bn_scale_shift(P['bn1'])
  bn1_scale = s1.reshape(1, -1).astype(f32)
  bn1_shift = t1.reshape(1, -1).astype(f32)

  gcn_w = jnp.stack(P['gcn_w'], 0).astype(f32)                          # (pip, 96, 54)
  gcn_b = jnp.stack(P['gcn_b'], 0)[:, None, :].astype(f32)              # (pip, 1, 54)

  # pressConv (Conv1d pip->1, kernel=pip, padding='same') as banded matrices:
  # out[:, l] = sum_{c,j} w[0,c,j] * h2_c[:, l + j - left]  ==  sum_c h2_c @ M_c
  C2 = P['gcn_w'][0].shape[1]
  K = pip
  left = (K - 1) // 2
  Ms = []
  for c in range(pip):
    M = jnp.zeros((C2, C2), f32)
    for j in range(K):
      M = M + P['press_w'][0, c, j] * jnp.eye(C2, k=left - j, dtype=f32)
    Ms.append(M)
  press_m = jnp.stack(Ms, 0)                                            # (pip, 54, 54)

  s2, t2 = bn_scale_shift(P['bn2'])
  bn2_scale = s2.reshape(1, -1).astype(f32)
  bn2_shift = (P['press_b'][0] * s2 + t2).reshape(1, -1).astype(f32)    # conv bias folded

  jk_w = [w.astype(f32) for w in P['jk_w']]
  jk_b = [b.reshape(1, -1).astype(f32) for b in P['jk_b']]

  # BN3 + fc1: split scale / fc1^T by the jk concat blocks; fold shift into a constant.
  s3, t3 = bn_scale_shift(P['bn3'])
  dims = [w.shape[1] for w in P['jk_w']]
  offs = np.cumsum([0] + dims)
  fc1t = P['fc1_w'].T.astype(f32)                                       # (75, 120)
  s3_split = [s3[offs[i]:offs[i + 1]].reshape(1, -1).astype(f32) for i in range(3)]
  fc1t_split = [fc1t[offs[i]:offs[i + 1], :] for i in range(3)]
  fc1_const = (jnp.dot(t3.reshape(1, -1), fc1t,
                       precision=jax.lax.Precision.HIGHEST)
               + P['fc1_b'].reshape(1, -1)).astype(f32)                 # (1, 120)

  fc2t = P['fc2_w'].T.astype(f32)                                       # (120, n_classes)
  fc2_b = P['fc2_b'].reshape(1, -1).astype(f32)

  args = (conv_w, conv_b, bn1_scale, bn1_shift, gcn_w, gcn_b,
          press_m, bn2_scale, bn2_shift,
          jk_w[0], jk_w[1], jk_w[2], jk_b[0], jk_b[1], jk_b[2],
          s3_split[0], s3_split[1], s3_split[2],
          fc1t_split[0], fc1t_split[1], fc1t_split[2], fc1_const,
          fc2t, fc2_b)
  return {'pip': pip, 'n_classes': int(fc2t.shape[1]), 'args': args}


# --------------------------------------------------------------------------
# Pure-JAX reference (mirrors the PyTorch semantics) for the sanity check
# --------------------------------------------------------------------------
def reference_forward(params, node_feats, adj):
  P = params
  pip = len(P['conv_w'])
  x = node_feats.astype(jnp.float32)
  h0 = x.T[None]                                                 # (1, 128, N)

  h0x = []
  for i in range(pip):
    d = i + 1
    y = jax.lax.conv_general_dilated(
        h0, P['conv_w'][i], window_strides=(1,),
        padding=[(d, d)], rhs_dilation=(d,),
        dimension_numbers=('NCH', 'OIH', 'NCH'))
    h0x.append(y + P['conv_b'][i][None, :, None])                # (1, 96, N)

  def bn(v, p, eps=1e-5):
    g, b, m, var = p
    return (v - m) / jnp.sqrt(var + eps) * g + b

  h2x = []
  for i in range(pip):
    a = h0x[i % pip][0].T
    b2 = h0x[(i + 1) % pip][0].T
    h1 = bn(jnp.maximum(a, 0.0) + b2, P['bn1'])
    g = adj @ (h1 @ P['gcn_w'][i]) + P['gcn_b'][i]
    h2x.append(jnp.maximum(g, 0.0))

  xp = jnp.transpose(jnp.stack(h2x, 0), (1, 0, 2))               # (N, pip, 54)
  K = pip
  left = (K - 1) // 2
  right = (K - 1) - left
  xpad = jnp.pad(xp, ((0, 0), (0, 0), (left, right)))
  out = jnp.zeros((xp.shape[0], xp.shape[2]), jnp.float32)
  for c in range(pip):
    for j in range(K):
      out = out + P['press_w'][0, c, j] * xpad[:, c, j:j + xp.shape[2]]
  out = out + P['press_b'][0]
  emd_h = bn(out, P['bn2'])

  h = emd_h
  feats = []
  for i in range(3):
    g = adj @ (h @ P['jk_w'][i]) + P['jk_b'][i]
    h = jnp.maximum(g, 0.0)
    feats.append(h)
  ac_h = jnp.concatenate(feats, 1)
  hg = jnp.sum(ac_h, axis=0, keepdims=True)
  hg = bn(hg, P['bn3'])
  z = hg @ P['fc1_w'].T + P['fc1_b']
  logits = z @ P['fc2_w'].T + P['fc2_b']
  return logits, emd_h


# --------------------------------------------------------------------------
# Deterministic parameter construction (synthetic, matches module shapes)
# --------------------------------------------------------------------------
def init_params(key, pip_num, n_classes):
  ks = iter(jax.random.split(key, 64))

  def nrm(shape, scale=0.1):
    return scale * jax.random.normal(next(ks), shape, jnp.float32)

  p = {}
  p['conv_w'] = [nrm((96, 128, 3)) for _ in range(pip_num)]
  p['conv_b'] = [nrm((96,)) for _ in range(pip_num)]
  p['gcn_w'] = [nrm((96, 54)) for _ in range(pip_num)]
  p['gcn_b'] = [nrm((54,)) for _ in range(pip_num)]
  p['press_w'] = nrm((1, pip_num, pip_num), 0.5)
  p['press_b'] = nrm((1,), 0.5)
  dims = [(54, 34), (34, 25), (25, 16)]
  p['jk_w'] = [nrm(d) for d in dims]
  p['jk_b'] = [nrm((d[1],)) for d in dims]
  p['fc1_w'] = nrm((120, 75))
  p['fc1_b'] = nrm((120,))
  p['fc2_w'] = nrm((n_classes, 120))
  p['fc2_b'] = nrm((n_classes,))

  def bn_init(n):
    return (1.0 + 0.1 * jax.random.normal(next(ks), (n,), jnp.float32),   # gamma
            0.1 * jax.random.normal(next(ks), (n,), jnp.float32),         # beta
            0.1 * jax.random.normal(next(ks), (n,), jnp.float32),         # running mean
            1.0 + 0.1 * jnp.abs(jax.random.normal(next(ks), (n,), jnp.float32)))  # var

  p['bn1'] = bn_init(96)
  p['bn2'] = bn_init(54)
  p['bn3'] = bn_init(75)
  return p


if __name__ == "__main__":
  pip_num = 2          # arg.pip_num
  num_labels = 5       # arg.num_labels
  N = 16               # number of graph nodes

  key = jax.random.PRNGKey(0)
  k_feat, k_mask, k_wt, k_param = jax.random.split(key, 4)

  node_feats = jax.random.normal(k_feat, (N, 128), jnp.float32)     # graph.ndata['h']
  mask = (jax.random.uniform(k_mask, (N, N)) < 0.4).astype(jnp.float32)
  edge_w = jax.random.uniform(k_wt, (N, N), jnp.float32)
  adj = mask * edge_w                                               # A[dst, src] = graph.edata['f']

  params = init_params(k_param, pip_num, num_labels)
  prep = prepare_params(params)

  logits, emd_h = classifier7_forward(prep, node_feats, adj)
  jax.block_until_ready((logits, emd_h))

  # Reference at float32 matmul precision; tolerance tightened from 5e-2 to 2e-3.
  with jax.default_matmul_precision("float32"):
    ref_logits, ref_emd = reference_forward(params, node_feats, adj)
  jax.block_until_ready((ref_logits, ref_emd))

  def check(a, b, name, tol=2e-3):
    a = np.asarray(a)
    b = np.asarray(b)
    rel = np.max(np.abs(a - b)) / (np.max(np.abs(b)) + 1e-6)
    assert rel < tol, f"{name} mismatch: max-normalized error {rel}"

  check(logits, ref_logits, "logits")
  check(emd_h, ref_emd, "emd_h")
  assert logits.shape == (1, num_labels) and emd_h.shape == (N, 54)

  print("KERNEL_OK")
</pallas_src>

<mosaic_0001>
module attributes {stable_mosaic.version = 11 : i64} {
  func.func @_classifier7_kernel(%arg0: memref<20x128xf32, #tpu.memory_space<vmem>>, %arg1: memref<16x16xf32, #tpu.memory_space<vmem>>, %arg2: memref<6x128x96xf32, #tpu.memory_space<vmem>>, %arg3: memref<2x1x96xf32, #tpu.memory_space<vmem>>, %arg4: memref<1x96xf32, #tpu.memory_space<vmem>>, %arg5: memref<1x96xf32, #tpu.memory_space<vmem>>, %arg6: memref<2x96x54xf32, #tpu.memory_space<vmem>>, %arg7: memref<2x1x54xf32, #tpu.memory_space<vmem>>, %arg8: memref<2x54x54xf32, #tpu.memory_space<vmem>>, %arg9: memref<1x54xf32, #tpu.memory_space<vmem>>, %arg10: memref<1x54xf32, #tpu.memory_space<vmem>>, %arg11: memref<54x34xf32, #tpu.memory_space<vmem>>, %arg12: memref<34x25xf32, #tpu.memory_space<vmem>>, %arg13: memref<25x16xf32, #tpu.memory_space<vmem>>, %arg14: memref<1x34xf32, #tpu.memory_space<vmem>>, %arg15: memref<1x25xf32, #tpu.memory_space<vmem>>, %arg16: memref<1x16xf32, #tpu.memory_space<vmem>>, %arg17: memref<1x34xf32, #tpu.memory_space<vmem>>, %arg18: memref<1x25xf32, #tpu.memory_space<vmem>>, %arg19: memref<1x16xf32, #tpu.memory_space<vmem>>, %arg20: memref<34x120xf32, #tpu.memory_space<vmem>>, %arg21: memref<25x120xf32, #tpu.memory_space<vmem>>, %arg22: memref<16x120xf32, #tpu.memory_space<vmem>>, %arg23: memref<1x120xf32, #tpu.memory_space<vmem>>, %arg24: memref<120x5xf32, #tpu.memory_space<vmem>>, %arg25: memref<1x5xf32, #tpu.memory_space<vmem>>, %arg26: memref<16x54xf32, #tpu.memory_space<vmem>>, %arg27: memref<1x5xf32, #tpu.memory_space<vmem>>) attributes {dimension_semantics = [], scalar_prefetch = 0 : i64, scratch_operands = 0 : i64, tpu.core_type = #tpu.core_type<tc>} {
    %c0 = arith.constant 0 : index
    %c0_0 = arith.constant 0 : index
    %0 = vector.load %arg0[%c0, %c0_0] : memref<20x128xf32, #tpu.memory_space<vmem>>, vector<20x128xf32>
    %c0_1 = arith.constant 0 : index
    %c0_2 = arith.constant 0 : index
    %1 = vector.load %arg1[%c0_1, %c0_2] : memref<16x16xf32, #tpu.memory_space<vmem>>, vector<16x16xf32>
    %2 = vector.extract_strided_slice %0 {offsets = [2, 0], sizes = [16, 128], strides = [1, 1]} : vector<20x128xf32> to vector<16x128xf32>
    %3 = vector.extract_strided_slice %0 {offsets = [1, 0], sizes = [16, 128], strides = [1, 1]} : vector<20x128xf32> to vector<16x128xf32>
    %4 = vector.extract_strided_slice %0 {offsets = [3, 0], sizes = [16, 128], strides = [1, 1]} : vector<20x128xf32> to vector<16x128xf32>
    %c0_3 = arith.constant 0 : index
    %c0_4 = arith.constant 0 : index
    %c0_5 = arith.constant 0 : index
    %5 = vector.load %arg2[%c0_3, %c0_4, %c0_5] : memref<6x128x96xf32, #tpu.memory_space<vmem>>, vector<1x128x96xf32>
    %6 = vector.shape_cast %5 : vector<1x128x96xf32> to vector<128x96xf32>
    %cst = arith.constant dense<0.000000e+00> : vector<16x96xf32>
    %7 = tpu.matmul %3, %6, %cst {dimension_numbers = #tpu.dot_dimension_numbers<[1], [0], [0], [1], [0, 0, 1, 1], [], []>} : vector<16x128xf32>, vector<128x96xf32>, vector<16x96xf32> -> vector<16x96xf32>
    %c1 = arith.constant 1 : index
    %c0_6 = arith.constant 0 : index
    %c0_7 = arith.constant 0 : index
    %8 = vector.load %arg2[%c1, %c0_6, %c0_7] : memref<6x128x96xf32, #tpu.memory_space<vmem>>, vector<1x128x96xf32>
    %9 = vector.shape_cast %8 : vector<1x128x96xf32> to vector<128x96xf32>
    %cst_8 = arith.constant dense<0.000000e+00> : vector<16x96xf32>
    %10 = tpu.matmul %2, %9, %cst_8 {dimension_numbers = #tpu.dot_dimension_numbers<[1], [0], [0], [1], [0, 0, 1, 1], [], []>} : vector<16x128xf32>, vector<128x96xf32>, vector<16x96xf32> -> vector<16x96xf32>
    %11 = arith.addf %7, %10 : vector<16x96xf32>
    %c2 = arith.constant 2 : index
    %c0_9 = arith.constant 0 : index
    %c0_10 = arith.constant 0 : index
    %12 = vector.load %arg2[%c2, %c0_9, %c0_10] : memref<6x128x96xf32, #tpu.memory_space<vmem>>, vector<1x128x96xf32>
    %13 = vector.shape_cast %12 : vector<1x128x96xf32> to vector<128x96xf32>
    %cst_11 = arith.constant dense<0.000000e+00> : vector<16x96xf32>
    %14 = tpu.matmul %4, %13, %cst_11 {dimension_numbers = #tpu.dot_dimension_numbers<[1], [0], [0], [1], [0, 0, 1, 1], [], []>} : vector<16x128xf32>, vector<128x96xf32>, vector<16x96xf32> -> vector<16x96xf32>
    %15 = arith.addf %11, %14 : vector<16x96xf32>
    %c0_12 = arith.constant 0 : index
    %c0_13 = arith.constant 0 : index
    %c0_14 = arith.constant 0 : index
    %16 = vector.load %arg3[%c0_12, %c0_13, %c0_14] : memref<2x1x96xf32, #tpu.memory_space<vmem>>, vector<1x1x96xf32>
    %17 = vector.shape_cast %16 : vector<1x1x96xf32> to vector<1x96xf32>
    %18 = vector.broadcast %17 : vector<1x96xf32> to vector<16x96xf32>
    %19 = arith.addf %15, %18 : vector<16x96xf32>
    %20 = vector.extract_strided_slice %0 {offsets = [0, 0], sizes = [16, 128], strides = [1, 1]} : vector<20x128xf32> to vector<16x128xf32>
    %21 = vector.extract_strided_slice %0 {offsets = [4, 0], sizes = [16, 128], strides = [1, 1]} : vector<20x128xf32> to vector<16x128xf32>
    %c3 = arith.constant 3 : index
    %c0_15 = arith.constant 0 : index
    %c0_16 = arith.constant 0 : index
    %22 = vector.load %arg2[%c3, %c0_15, %c0_16] : memref<6x128x96xf32, #tpu.memory_space<vmem>>, vector<1x128x96xf32>
    %23 = vector.shape_cast %22 : vector<1x128x96xf32> to vector<128x96xf32>
    %cst_17 = arith.constant dense<0.000000e+00> : vector<16x96xf32>
    %24 = tpu.matmul %20, %23, %cst_17 {dimension_numbers = #tpu.dot_dimension_numbers<[1], [0], [0], [1], [0, 0, 1, 1], [], []>} : vector<16x128xf32>, vector<128x96xf32>, vector<16x96xf32> -> vector<16x96xf32>
    %c4 = arith.constant 4 : index
    %c0_18 = arith.constant 0 : index
    %c0_19 = arith.constant 0 : index
    %25 = vector.load %arg2[%c4, %c0_18, %c0_19] : memref<6x128x96xf32, #tpu.memory_space<vmem>>, vector<1x128x96xf32>
    %26 = vector.shape_cast %25 : vector<1x128x96xf32> to vector<128x96xf32>
    %cst_20 = arith.constant dense<0.000000e+00> : vector<16x96xf32>
    %27 = tpu.matmul %2, %26, %cst_20 {dimension_numbers = #tpu.dot_dimension_numbers<[1], [0], [0], [1], [0, 0, 1, 1], [], []>} : vector<16x128xf32>, vector<128x96xf32>, vector<16x96xf32> -> vector<16x96xf32>
    %28 = arith.addf %24, %27 : vector<16x96xf32>
    %c5 = arith.constant 5 : index
    %c0_21 = arith.constant 0 : index
    %c0_22 = arith.constant 0 : index
    %29 = vector.load %arg2[%c5, %c0_21, %c0_22] : memref<6x128x96xf32, #tpu.memory_space<vmem>>, vector<1x128x96xf32>
    %30 = vector.shape_cast %29 : vector<1x128x96xf32> to vector<128x96xf32>
    %cst_23 = arith.constant dense<0.000000e+00> : vector<16x96xf32>
    %31 = tpu.matmul %21, %30, %cst_23 {dimension_numbers = #tpu.dot_dimension_numbers<[1], [0], [0], [1], [0, 0, 1, 1], [], []>} : vector<16x128xf32>, vector<128x96xf32>, vector<16x96xf32> -> vector<16x96xf32>
    %32 = arith.addf %28, %31 : vector<16x96xf32>
    %c1_24 = arith.constant 1 : index
    %c0_25 = arith.constant 0 : index
    %c0_26 = arith.constant 0 : index
    %33 = vector.load %arg3[%c1_24, %c0_25, %c0_26] : memref<2x1x96xf32, #tpu.memory_space<vmem>>, vector<1x1x96xf32>
    %34 = vector.shape_cast %33 : vector<1x1x96xf32> to vector<1x96xf32>
    %35 = vector.broadcast %34 : vector<1x96xf32> to vector<16x96xf32>
    %36 = arith.addf %32, %35 : vector<16x96xf32>
    %c0_27 = arith.constant 0 : index
    %c0_28 = arith.constant 0 : index
    %37 = vector.load %arg4[%c0_27, %c0_28] : memref<1x96xf32, #tpu.memory_space<vmem>>, vector<1x96xf32>
    %c0_29 = arith.constant 0 : index
    %c0_30 = arith.constant 0 : index
    %38 = vector.load %arg5[%c0_29, %c0_30] : memref<1x96xf32, #tpu.memory_space<vmem>>, vector<1x96xf32>
    %cst_31 = arith.constant 0.000000e+00 : f32
    %39 = vector.broadcast %cst_31 : f32 to vector<16x96xf32>
    %40 = arith.maximumf %19, %39 : vector<16x96xf32>
    %41 = arith.addf %40, %36 : vector<16x96xf32>
    %42 = vector.broadcast %37 : vector<1x96xf32> to vector<16x96xf32>
    %43 = arith.mulf %41, %42 : vector<16x96xf32>
    %44 = vector.broadcast %38 : vector<1x96xf32> to vector<16x96xf32>
    %45 = arith.addf %43, %44 : vector<16x96xf32>
    %c0_32 = arith.constant 0 : index
    %c0_33 = arith.constant 0 : index
    %c0_34 = arith.constant 0 : index
    %46 = vector.load %arg6[%c0_32, %c0_33, %c0_34] : memref<2x96x54xf32, #tpu.memory_space<vmem>>, vector<1x96x54xf32>
    %47 = vector.shape_cast %46 : vector<1x96x54xf32> to vector<96x54xf32>
    %cst_35 = arith.constant dense<0.000000e+00> : vector<16x54xf32>
    %48 = tpu.matmul %45, %47, %cst_35 {dimension_numbers = #tpu.dot_dimension_numbers<[1], [0], [0], [1], [0, 0, 1, 1], [], []>} : vector<16x96xf32>, vector<96x54xf32>, vector<16x54xf32> -> vector<16x54xf32>
    %cst_36 = arith.constant dense<0.000000e+00> : vector<16x54xf32>
    %49 = tpu.matmul %1, %48, %cst_36 {dimension_numbers = #tpu.dot_dimension_numbers<[1], [0], [0], [1], [0, 0, 1, 1], [], []>} : vector<16x16xf32>, vector<16x54xf32>, vector<16x54xf32> -> vector<16x54xf32>
    %c0_37 = arith.constant 0 : index
    %c0_38 = arith.constant 0 : index
    %c0_39 = arith.constant 0 : index
    %50 = vector.load %arg7[%c0_37, %c0_38, %c0_39] : memref<2x1x54xf32, #tpu.memory_space<vmem>>, vector<1x1x54xf32>
    %51 = vector.shape_cast %50 : vector<1x1x54xf32> to vector<1x54xf32>
    %52 = vector.broadcast %51 : vector<1x54xf32> to vector<16x54xf32>
    %53 = arith.addf %49, %52 : vector<16x54xf32>
    %cst_40 = arith.constant 0.000000e+00 : f32
    %54 = vector.broadcast %cst_40 : f32 to vector<16x54xf32>
    %55 = arith.maximumf %53, %54 : vector<16x54xf32>
    %cst_41 = arith.constant 0.000000e+00 : f32
    %56 = vector.broadcast %cst_41 : f32 to vector<16x96xf32>
    %57 = arith.maximumf %36, %56 : vector<16x96xf32>
    %58 = arith.addf %57, %19 : vector<16x96xf32>
    %59 = vector.broadcast %37 : vector<1x96xf32> to vector<16x96xf32>
    %60 = arith.mulf %58, %59 : vector<16x96xf32>
    %61 = vector.broadcast %38 : vector<1x96xf32> to vector<16x96xf32>
    %62 = arith.addf %60, %61 : vector<16x96xf32>
    %c1_42 = arith.constant 1 : index
    %c0_43 = arith.constant 0 : index
    %c0_44 = arith.constant 0 : index
    %63 = vector.load %arg6[%c1_42, %c0_43, %c0_44] : memref<2x96x54xf32, #tpu.memory_space<vmem>>, vector<1x96x54xf32>
    %64 = vector.shape_cast %63 : vector<1x96x54xf32> to vector<96x54xf32>
    %cst_45 = arith.constant dense<0.000000e+00> : vector<16x54xf32>
    %65 = tpu.matmul %62, %64, %cst_45 {dimension_numbers = #tpu.dot_dimension_numbers<[1], [0], [0], [1], [0, 0, 1, 1], [], []>} : vector<16x96xf32>, vector<96x54xf32>, vector<16x54xf32> -> vector<16x54xf32>
    %cst_46 = arith.constant dense<0.000000e+00> : vector<16x54xf32>
    %66 = tpu.matmul %1, %65, %cst_46 {dimension_numbers = #tpu.dot_dimension_numbers<[1], [0], [0], [1], [0, 0, 1, 1], [], []>} : vector<16x16xf32>, vector<16x54xf32>, vector<16x54xf32> -> vector<16x54xf32>
    %c1_47 = arith.constant 1 : index
    %c0_48 = arith.constant 0 : index
    %c0_49 = arith.constant 0 : index
    %67 = vector.load %arg7[%c1_47, %c0_48, %c0_49] : memref<2x1x54xf32, #tpu.memory_space<vmem>>, vector<1x1x54xf32>
    %68 = vector.shape_cast %67 : vector<1x1x54xf32> to vector<1x54xf32>
    %69 = vector.broadcast %68 : vector<1x54xf32> to vector<16x54xf32>
    %70 = arith.addf %66, %69 : vector<16x54xf32>
    %cst_50 = arith.constant 0.000000e+00 : f32
    %71 = vector.broadcast %cst_50 : f32 to vector<16x54xf32>
    %72 = arith.maximumf %70, %71 : vector<16x54xf32>
    %c0_51 = arith.constant 0 : index
    %c0_52 = arith.constant 0 : index
    %c0_53 = arith.constant 0 : index
    %73 = vector.load %arg8[%c0_51, %c0_52, %c0_53] : memref<2x54x54xf32, #tpu.memory_space<vmem>>, vector<1x54x54xf32>
    %74 = vector.shape_cast %73 : vector<1x54x54xf32> to vector<54x54xf32>
    %cst_54 = arith.constant dense<0.000000e+00> : vector<16x54xf32>
    %75 = tpu.matmul %55, %74, %cst_54 {dimension_numbers = #tpu.dot_dimension_numbers<[1], [0], [0], [1], [0, 0, 1, 1], [], []>} : vector<16x54xf32>, vector<54x54xf32>, vector<16x54xf32> -> vector<16x54xf32>
    %c1_55 = arith.constant 1 : index
    %c0_56 = arith.constant 0 : index
    %c0_57 = arith.constant 0 : index
    %76 = vector.load %arg8[%c1_55, %c0_56, %c0_57] : memref<2x54x54xf32, #tpu.memory_space<vmem>>, vector<1x54x54xf32>
    %77 = vector.shape_cast %76 : vector<1x54x54xf32> to vector<54x54xf32>
    %cst_58 = arith.constant dense<0.000000e+00> : vector<16x54xf32>
    %78 = tpu.matmul %72, %77, %cst_58 {dimension_numbers = #tpu.dot_dimension_numbers<[1], [0], [0], [1], [0, 0, 1, 1], [], []>} : vector<16x54xf32>, vector<54x54xf32>, vector<16x54xf32> -> vector<16x54xf32>
    %79 = arith.addf %75, %78 : vector<16x54xf32>
    %c0_59 = arith.constant 0 : index
    %c0_60 = arith.constant 0 : index
    %80 = vector.load %arg9[%c0_59, %c0_60] : memref<1x54xf32, #tpu.memory_space<vmem>>, vector<1x54xf32>
    %81 = vector.broadcast %80 : vector<1x54xf32> to vector<16x54xf32>
    %82 = arith.mulf %79, %81 : vector<16x54xf32>
    %c0_61 = arith.constant 0 : index
    %c0_62 = arith.constant 0 : index
    %83 = vector.load %arg10[%c0_61, %c0_62] : memref<1x54xf32, #tpu.memory_space<vmem>>, vector<1x54xf32>
    %84 = vector.broadcast %83 : vector<1x54xf32> to vector<16x54xf32>
    %85 = arith.addf %82, %84 : vector<16x54xf32>
    %c0_63 = arith.constant 0 : index
    %c0_64 = arith.constant 0 : index
    %86 = vector.load %arg26[%c0_63, %c0_64] : memref<16x54xf32, #tpu.memory_space<vmem>>, vector<16x54xf32>
    tpu.vector_store %arg26[%c0_63, %c0_64], %85 {strides = array<i32>} : memref<16x54xf32, #tpu.memory_space<vmem>>, vector<16x54xf32>,
    %cst_65 = arith.constant 0.000000e+00 : f32
    %87 = vector.broadcast %cst_65 : f32 to vector<16x120xf32>
    %c0_66 = arith.constant 0 : index
    %c0_67 = arith.constant 0 : index
    %88 = vector.load %arg11[%c0_66, %c0_67] : memref<54x34xf32, #tpu.memory_space<vmem>>, vector<54x34xf32>
    %cst_68 = arith.constant dense<0.000000e+00> : vector<16x34xf32>
    %89 = tpu.matmul %85, %88, %cst_68 {dimension_numbers = #tpu.dot_dimension_numbers<[1], [0], [0], [1], [0, 0, 1, 1], [], []>} : vector<16x54xf32>, vector<54x34xf32>, vector<16x34xf32> -> vector<16x34xf32>
    %cst_69 = arith.constant dense<0.000000e+00> : vector<16x34xf32>
    %90 = tpu.matmul %1, %89, %cst_69 {dimension_numbers = #tpu.dot_dimension_numbers<[1], [0], [0], [1], [0, 0, 1, 1], [], []>} : vector<16x16xf32>, vector<16x34xf32>, vector<16x34xf32> -> vector<16x34xf32>
    %c0_70 = arith.constant 0 : index
    %c0_71 = arith.constant 0 : index
    %91 = vector.load %arg14[%c0_70, %c0_71] : memref<1x34xf32, #tpu.memory_space<vmem>>, vector<1x34xf32>
    %92 = vector.broadcast %91 : vector<1x34xf32> to vector<16x34xf32>
    %93 = arith.addf %90, %92 : vector<16x34xf32>
    %cst_72 = arith.constant 0.000000e+00 : f32
    %94 = vector.broadcast %cst_72 : f32 to vector<16x34xf32>
    %95 = arith.maximumf %93, %94 : vector<16x34xf32>
    %c0_73 = arith.constant 0 : index
    %c0_74 = arith.constant 0 : index
    %96 = vector.load %arg17[%c0_73, %c0_74] : memref<1x34xf32, #tpu.memory_space<vmem>>, vector<1x34xf32>
    %97 = vector.broadcast %96 : vector<1x34xf32> to vector<16x34xf32>
    %98 = arith.mulf %95, %97 : vector<16x34xf32>
    %c0_75 = arith.constant 0 : index
    %c0_76 = arith.constant 0 : index
    %99 = vector.load %arg20[%c0_75, %c0_76] : memref<34x120xf32, #tpu.memory_space<vmem>>, vector<34x120xf32>
    %cst_77 = arith.constant dense<0.000000e+00> : vector<16x120xf32>
    %100 = tpu.matmul %98, %99, %cst_77 {dimension_numbers = #tpu.dot_dimension_numbers<[1], [0], [0], [1], [0, 0, 1, 1], [], []>} : vector<16x34xf32>, vector<34x120xf32>, vector<16x120xf32> -> vector<16x120xf32>
    %101 = arith.addf %87, %100 : vector<16x120xf32>
    %c0_78 = arith.constant 0 : index
    %c0_79 = arith.constant 0 : index
    %102 = vector.load %arg12[%c0_78, %c0_79] : memref<34x25xf32, #tpu.memory_space<vmem>>, vector<34x25xf32>
    %cst_80 = arith.constant dense<0.000000e+00> : vector<16x25xf32>
    %103 = tpu.matmul %95, %102, %cst_80 {dimension_numbers = #tpu.dot_dimension_numbers<[1], [0], [0], [1], [0, 0, 1, 1], [], []>} : vector<16x34xf32>, vector<34x25xf32>, vector<16x25xf32> -> vector<16x25xf32>
    %cst_81 = arith.constant dense<0.000000e+00> : vector<16x25xf32>
    %104 = tpu.matmul %1, %103, %cst_81 {dimension_numbers = #tpu.dot_dimension_numbers<[1], [0], [0], [1], [0, 0, 1, 1], [], []>} : vector<16x16xf32>, vector<16x25xf32>, vector<16x25xf32> -> vector<16x25xf32>
    %c0_82 = arith.constant 0 : index
    %c0_83 = arith.constant 0 : index
    %105 = vector.load %arg15[%c0_82, %c0_83] : memref<1x25xf32, #tpu.memory_space<vmem>>, vector<1x25xf32>
    %106 = vector.broadcast %105 : vector<1x25xf32> to vector<16x25xf32>
    %107 = arith.addf %104, %106 : vector<16x25xf32>
    %cst_84 = arith.constant 0.000000e+00 : f32
    %108 = vector.broadcast %cst_84 : f32 to vector<16x25xf32>
    %109 = arith.maximumf %107, %108 : vector<16x25xf32>
    %c0_85 = arith.constant 0 : index
    %c0_86 = arith.constant 0 : index
    %110 = vector.load %arg18[%c0_85, %c0_86] : memref<1x25xf32, #tpu.memory_space<vmem>>, vector<1x25xf32>
    %111 = vector.broadcast %110 : vector<1x25xf32> to vector<16x25xf32>
    %112 = arith.mulf %109, %111 : vector<16x25xf32>
    %c0_87 = arith.constant 0 : index
    %c0_88 = arith.constant 0 : index
    %113 = vector.load %arg21[%c0_87, %c0_88] : memref<25x120xf32, #tpu.memory_space<vmem>>, vector<25x120xf32>
    %cst_89 = arith.constant dense<0.000000e+00> : vector<16x120xf32>
    %114 = tpu.matmul %112, %113, %cst_89 {dimension_numbers = #tpu.dot_dimension_numbers<[1], [0], [0], [1], [0, 0, 1, 1], [], []>} : vector<16x25xf32>, vector<25x120xf32>, vector<16x120xf32> -> vector<16x120xf32>
    %115 = arith.addf %101, %114 : vector<16x120xf32>
    %c0_90 = arith.constant 0 : index
    %c0_91 = arith.constant 0 : index
    %116 = vector.load %arg13[%c0_90, %c0_91] : memref<25x16xf32, #tpu.memory_space<vmem>>, vector<25x16xf32>
    %cst_92 = arith.constant dense<0.000000e+00> : vector<16x16xf32>
    %117 = tpu.matmul %109, %116, %cst_92 {dimension_numbers = #tpu.dot_dimension_numbers<[1], [0], [0], [1], [0, 0, 1, 1], [], []>} : vector<16x25xf32>, vector<25x16xf32>, vector<16x16xf32> -> vector<16x16xf32>
    %cst_93 = arith.constant dense<0.000000e+00> : vector<16x16xf32>
    %118 = tpu.matmul %1, %117, %cst_93 {dimension_numbers = #tpu.dot_dimension_numbers<[1], [0], [0], [1], [0, 0, 1, 1], [], []>} : vector<16x16xf32>, vector<16x16xf32>, vector<16x16xf32> -> vector<16x16xf32>
    %c0_94 = arith.constant 0 : index
    %c0_95 = arith.constant 0 : index
    %119 = vector.load %arg16[%c0_94, %c0_95] : memref<1x16xf32, #tpu.memory_space<vmem>>, vector<1x16xf32>
    %120 = vector.broadcast %119 : vector<1x16xf32> to vector<16x16xf32>
    %121 = arith.addf %118, %120 : vector<16x16xf32>
    %cst_96 = arith.constant 0.000000e+00 : f32
    %122 = vector.broadcast %cst_96 : f32 to vector<16x16xf32>
    %123 = arith.maximumf %121, %122 : vector<16x16xf32>
    %c0_97 = arith.constant 0 : index
    %c0_98 = arith.constant 0 : index
    %124 = vector.load %arg19[%c0_97, %c0_98] : memref<1x16xf32, #tpu.memory_space<vmem>>, vector<1x16xf32>
    %125 = vector.broadcast %124 : vector<1x16xf32> to vector<16x16xf32>
    %126 = arith.mulf %123, %125 : vector<16x16xf32>
    %c0_99 = arith.constant 0 : index
    %c0_100 = arith.constant 0 : index
    %127 = vector.load %arg22[%c0_99, %c0_100] : memref<16x120xf32, #tpu.memory_space<vmem>>, vector<16x120xf32>
    %cst_101 = arith.constant dense<0.000000e+00> : vector<16x120xf32>
    %128 = tpu.matmul %126, %127, %cst_101 {dimension_numbers = #tpu.dot_dimension_numbers<[1], [0], [0], [1], [0, 0, 1, 1], [], []>} : vector<16x16xf32>, vector<16x120xf32>, vector<16x120xf32> -> vector<16x120xf32>
    %129 = arith.addf %115, %128 : vector<16x120xf32>
    %c0_102 = arith.constant 0 : index
    %c0_103 = arith.constant 0 : index
    %130 = vector.load %arg23[%c0_102, %c0_103] : memref<1x120xf32, #tpu.memory_space<vmem>>, vector<1x120xf32>
    %cst_104 = arith.constant 6.250000e-02 : f32
    %131 = vector.broadcast %cst_104 : f32 to vector<1x120xf32>
    %132 = arith.mulf %130, %131 : vector<1x120xf32>
    %133 = vector.broadcast %132 : vector<1x120xf32> to vector<16x120xf32>
    %134 = arith.addf %129, %133 : vector<16x120xf32>
    %c0_105 = arith.constant 0 : index
    %c0_106 = arith.constant 0 : index
    %135 = vector.load %arg24[%c0_105, %c0_106] : memref<120x5xf32, #tpu.memory_space<vmem>>, vector<120x5xf32>
    %cst_107 = arith.constant dense<0.000000e+00> : vector<16x5xf32>
    %136 = tpu.matmul %134, %135, %cst_107 {dimension_numbers = #tpu.dot_dimension_numbers<[1], [0], [0], [1], [0, 0, 1, 1], [], []>} : vector<16x120xf32>, vector<120x5xf32>, vector<16x5xf32> -> vector<16x5xf32>
    %cst_108 = arith.constant dense<0.000000e+00> : vector<5xf32>
    %137 = vector.multi_reduction <add>, %136, %cst_108 [0] : vector<16x5xf32> to vector<5xf32>
    %138 = vector.shape_cast %137 : vector<5xf32> to vector<1x5xf32>
    %c0_109 = arith.constant 0 : index
    %c0_110 = arith.constant 0 : index
    %139 = vector.load %arg25[%c0_109, %c0_110] : memref<1x5xf32, #tpu.memory_space<vmem>>, vector<1x5xf32>
    %140 = arith.addf %138, %139 : vector<1x5xf32>
    %c0_111 = arith.constant 0 : index
    %c0_112 = arith.constant 0 : index
    %141 = vector.load %arg27[%c0_111, %c0_112] : memref<1x5xf32, #tpu.memory_space<vmem>>, vector<1x5xf32>
    tpu.vector_store %arg27[%c0_111, %c0_112], %140 {strides = array<i32>} : memref<1x5xf32, #tpu.memory_space<vmem>>, vector<1x5xf32>,
    return
  }
}

</mosaic_0001>

<bundles_post_ra>
// kernel: _forward_impl.1
= control target key start
LH: loop header
LB: loop body
LE: loop exit
PB: predicated region body
PF: predicated region fallthrough
CT: control target
= control target key end

     0   :  { %s2101_s0 = inlined_call_operand.vmem [shape: f32[20,128], index: 0, kind: input, shape index: {}]   ;;  %s2102_s1 = inlined_call_operand.vmem [shape: f32[16,16], index: 1, kind: input, shape index: {}]   ;;  %s2103_s2 = inlined_call_operand.vmem [shape: f32[6,128,96], index: 2, kind: input, shape index: {}]   ;;  %s2104_s3 = inlined_call_operand.vmem [shape: f32[2,1,96], index: 3, kind: input, shape index: {}]   ;;  %s2105_s4 = inlined_call_operand.vmem [shape: f32[1,96], index: 4, kind: input, shape index: {}]   ;;  %s2106_s5 = inlined_call_operand.vmem [shape: f32[1,96], index: 5, kind: input, shape index: {}]   ;;  %s2107_s6 = inlined_call_operand.vmem [shape: f32[2,96,54], index: 6, kind: input, shape index: {}]   ;;  %s2108_s7 = inlined_call_operand.vmem [shape: f32[2,1,54], index: 7, kind: input, shape index: {}]   ;;  %s2109_s8 = inlined_call_operand.vmem [shape: f32[2,54,54], index: 8, kind: input, shape index: {}]   ;;  %s2110_s9 = inlined_call_operand.vmem [shape: f32[1,54], index: 9, kind: input, shape index: {}]   ;;  %s2111_s10 = inlined_call_operand.vmem [shape: f32[1,54], index: 10, kind: input, shape index: {}]   ;;  %s2112_s11 = inlined_call_operand.vmem [shape: f32[54,34], index: 11, kind: input, shape index: {}]   ;;  %s2113_s12 = inlined_call_operand.vmem [shape: f32[34,25], index: 12, kind: input, shape index: {}]   ;;  %s2114_s13 = inlined_call_operand.vmem [shape: f32[25,16], index: 13, kind: input, shape index: {}]   ;;  %s2115_s14 = inlined_call_operand.vmem [shape: f32[1,34], index: 14, kind: input, shape index: {}]   ;;  %s2116_s15 = inlined_call_operand.vmem [shape: f32[1,25], index: 15, kind: input, shape index: {}]   ;;  %s2117_s16 = inlined_call_operand.vmem [shape: f32[1,16], index: 16, kind: input, shape index: {}]   ;;  %s2118_s17 = inlined_call_operand.vmem [shape: f32[1,34], index: 17, kind: input, shape index: {}]   ;;  %s2119_s18 = inlined_call_operand.vmem [shape: f32[1,25], index: 18, kind: input, shape index: {}]   ;;  %s2120_s19 = inlined_call_operand.vmem [shape: f32[1,16], index: 19, kind: input, shape index: {}]   ;;  %s2121_s20 = inlined_call_operand.vmem [shape: f32[34,120], index: 20, kind: input, shape index: {}]   ;;  %s2122_s21 = inlined_call_operand.vmem [shape: f32[25,120], index: 21, kind: input, shape index: {}]   ;;  %s2123_s22 = inlined_call_operand.vmem [shape: f32[16,120], index: 22, kind: input, shape index: {}]   ;;  %s2124_s23 = inlined_call_operand.vmem [shape: f32[1,120], index: 23, kind: input, shape index: {}]   ;;  %s2125_s24 = inlined_call_operand.vmem [shape: f32[120,5], index: 24, kind: input, shape index: {}]   ;;  %s2126_s25 = inlined_call_operand.vmem [shape: f32[1,5], index: 25, kind: input, shape index: {}]   ;;  %s2127_s26 = inlined_call_operand.hbm [shape: f32[16,54], index: 26, kind: output, shape index: {0}]   ;;  %s2128_s27 = inlined_call_operand.hbm [shape: f32[1,5], index: 27, kind: output, shape index: {1}]  }
   0x1   :  { %2137 = sst [smem:[#allocation8_spill]] %s2101_s0 }
   0x2   :  { %2138 = sst [smem:[#allocation9_spill]] %s2102_s1 }
   0x3   :  { %2139 = sst [smem:[#allocation10_spill]] %s2103_s2 }
   0x4   :  { %2140 = sst [smem:[#allocation11_spill]] %s2104_s3 }
   0x5   :  { %2141 = sst [smem:[#allocation12_spill]] %s2105_s4 }
   0x6   :  { %2142 = sst [smem:[#allocation13_spill]] %s2106_s5 }
   0x7   :  { %2143 = sst [smem:[#allocation14_spill]] %s2107_s6 }
   0x8   :  { %2144 = sst [smem:[#allocation15_spill]] %s2108_s7 }
   0x9   :  { %2145 = sst [smem:[#allocation16_spill]] %s2109_s8 }
   0xa   :  { %2146 = sst [smem:[#allocation17_spill]] %s2110_s9 }
   0xb   :  { %2147 = sst [smem:[#allocation18_spill]] %s2111_s10 }
   0xc   :  { %2148 = sst [smem:[#allocation19_spill]] %s2112_s11 }
   0xd   :  { %33 = vsyncpa [#allocation3], 0  ;;  %s2149_s8 = sld [smem:[#allocation10_spill]]  ;;  %vm128_vm0 = vcmask 1045504   ;;  %vm207_vm1 = vcmask 1044480   ;;  %vm159_vm2 = vcmask 1046528  }
   0xe   :  { %s2150_s6 = sld [smem:[#allocation8_spill]] }
  0x13   :  { %v1093_v0 = vld [vmem:[%s2149_s8 + $0xf8] sm:$0xff]  ;;  %v1092_v1 = vld [vmem:[%s2149_s8 + $0xf0] sm:$0xff]  ;;  %v1091_v4 = vld [vmem:[%s2149_s8 + $0xe8] sm:$0xff] }
  0x14   :  { %v107_v2 = vld [vmem:[%s2149_s8 + $0x78] sm:$0xff]  ;;  %136 = vmatpush.msra.mxu0 %v1093_v0  ;;  %v106_v3 = vld [vmem:[%s2149_s8 + $0x70] sm:$0xff]  ;;  %v105_v5 = vld [vmem:[%s2149_s8 + $0x68] sm:$0xff] }
  0x15   :  { %167 = vmatpush.msra.mxu1 %v107_v2  ;;  %v1109_v6 = vld [vmem:[%s2149_s8 + $0x178] sm:$0xff]  ;;  %v1090_v7 = vld [vmem:[%s2149_s8 + $0xe0] sm:$0xff]  ;;  %v1108_v9 = vld [vmem:[%s2149_s8 + $0x170] sm:$0xff] }
  0x16   :  { %137 = vmatpush.msra.mxu0 %v1092_v1  ;;  %v104_v8 = vld [vmem:[%s2149_s8 + $0x60] sm:$0xff]  ;;  %215 = vmatpush.msra.mxu2 %v1109_v6  ;;  %v1107_v10 = vld [vmem:[%s2149_s8 + $0x168] sm:$0xff]  ;;  %v1089_v11 = vld [vmem:[%s2149_s8 + $0xd8] sm:$0xff] }
  0x17   :  { %168 = vmatpush.msra.mxu1 %v106_v3  ;;  %v103_v12 = vld [vmem:[%s2149_s8 + $0x58] sm:$0xff]  ;;  %v1106_v13 = vld [vmem:[%s2149_s8 + $0x160] sm:$0xff]  ;;  %v1088_v14 = vld [vmem:[%s2149_s8 + $0xd0] sm:$0xff] }
  0x18   :  { %138 = vmatpush.msra.mxu0 %v1091_v4  ;;  %216 = vmatpush.msra.mxu2 %v1108_v9  ;;  %v102_v15 = vld [vmem:[%s2149_s8 + $0x50] sm:$0xff]  ;;  %v1105_v16 = vld [vmem:[%s2149_s8 + $0x158] sm:$0xff]  ;;  %v1087_v17 = vld [vmem:[%s2149_s8 + $0xc8] sm:$0xff] }
  0x19   :  { %169 = vmatpush.msra.mxu1 %v105_v5  ;;  %v101_v18 = vld [vmem:[%s2149_s8 + $0x48] sm:$0xff]  ;;  %v1104_v19 = vld [vmem:[%s2149_s8 + $0x150] sm:$0xff]  ;;  %v1141_v20 = vld [vmem:[%s2149_s8 + $0x278] sm:$0xff] }
  0x1a   :  { %139 = vmatpush.msra.mxu0 %v1090_v7  ;;  %217 = vmatpush.msra.mxu2 %v1107_v10  ;;  %v1086_v21 = vld [vmem:[%s2149_s8 + $0xc0] sm:$0xff]  ;;  %v1140_v23 = vld [vmem:[%s2149_s8 + $0x270] sm:$0xff]  ;;  %v1103_v24 = vld [vmem:[%s2149_s8 + $0x148] sm:$0xff] }
  0x1b   :  { %170 = vmatpush.msra.mxu1 %v104_v8  ;;  %v100_v22 = vld [vmem:[%s2149_s8 + $0x40] sm:$0xff]  ;;  %280 = vmatpush.msra.mxu3 %v1141_v20  ;;  %v1139_v25 = vld [vmem:[%s2149_s8 + $0x268] sm:$0xff]  ;;  %v1085_v26 = vld [vmem:[%s2149_s8 + $0xb8] sm:$0xff] }
  0x1c   :  { %140 = vmatpush.msra.mxu0 %v1089_v11  ;;  %218 = vmatpush.msra.mxu2 %v1106_v13  ;;  %v99_v27 = vld [vmem:[%s2149_s8 + $0x38] sm:$0xff]  ;;  %v1102_v28 = vld [vmem:[%s2149_s8 + $0x140] sm:$0xff]  ;;  %v1084_v30 = vld [vmem:[%s2149_s8 + $0xb0] sm:$0xff] }
  0x1d   :  { %171 = vmatpush.msra.mxu1 %v103_v12  ;;  %281 = vmatpush.msra.mxu3 %v1140_v23  ;;  %v1138_v29 = vld [vmem:[%s2149_s8 + $0x260] sm:$0xff]  ;;  %v98_v31 = vld [vmem:[%s2149_s8 + $0x30] sm:$0xff]  ;;  %v1101_v32 = vld [vmem:[%s2149_s8 + $0x138] sm:$0xff] }
  0x1e   :  { %141 = vmatpush.msra.mxu0 %v1088_v14  ;;  %219 = vmatpush.msra.mxu2 %v1105_v16  ;;  %v1137_v33 = vld [vmem:[%s2149_s8 + $0x258] sm:$0xff]  ;;  %v1083_v34 = vld [vmem:[%s2149_s8 + $0xa8] sm:$0xff]  ;;  %v1100_v36 = vld [vmem:[%s2149_s8 + $0x130] sm:$0xff] }
  0x1f   :  { %172 = vmatpush.msra.mxu1 %v102_v15  ;;  %282 = vmatpush.msra.mxu3 %v1139_v25  ;;  %v97_v35 = vld [vmem:[%s2149_s8 + $0x28] sm:$0xff]  ;;  %v1136_v37 = vld [vmem:[%s2149_s8 + $0x250] sm:$0xff]  ;;  %v1082_v38 = vld [vmem:[%s2149_s8 + $0xa0] sm:$0xff] }
  0x20   :  { %142 = vmatpush.msra.mxu0 %v1087_v17  ;;  %220 = vmatpush.msra.mxu2 %v1104_v19  ;;  %v96_v39 = vld [vmem:[%s2149_s8 + $0x20] sm:$0xff]  ;;  %v1099_v40 = vld [vmem:[%s2149_s8 + $0x128] sm:$0xff]  ;;  %v1081_v42 = vld [vmem:[%s2149_s8 + $0x98] sm:$0xff] }
  0x21   :  { %173 = vmatpush.msra.mxu1 %v101_v18  ;;  %283 = vmatpush.msra.mxu3 %v1138_v29  ;;  %v1135_v41 = vld [vmem:[%s2149_s8 + $0x248] sm:$0xff]  ;;  %v95_v43 = vld [vmem:[%s2149_s8 + $0x18] sm:$0xff]  ;;  %v1098_v44 = vld [vmem:[%s2149_s8 + $0x120] sm:$0xff] }
  0x22   :  { %143 = vmatpush.msra.mxu0 %v1086_v21  ;;  %221 = vmatpush.msra.mxu2 %v1103_v24  ;;  %v1134_v45 = vld [vmem:[%s2149_s8 + $0x240] sm:$0xff]  ;;  %v1080_v46 = vld [vmem:[%s2149_s8 + $0x90] sm:$0xff]  ;;  %v1097_v48 = vld [vmem:[%s2149_s8 + $0x118] sm:$0xff] }
  0x23   :  { %174 = vmatpush.msra.mxu1 %v100_v22  ;;  %284 = vmatpush.msra.mxu3 %v1137_v33  ;;  %v94_v47 = vld [vmem:[%s2149_s8 + $0x10] sm:$0xff]  ;;  %v1133_v49 = vld [vmem:[%s2149_s8 + $0x238] sm:$0xff]  ;;  %v1079_v50 = vld [vmem:[%s2149_s8 + $0x88] sm:$0xff] }
  0x24   :  { %144 = vmatpush.msra.mxu0 %v1085_v26  ;;  %222 = vmatpush.msra.mxu2 %v1102_v28  ;;  %v93_v51 = vld [vmem:[%s2149_s8 + $0x8] sm:$0xff]  ;;  %v1096_v52 = vld [vmem:[%s2149_s8 + $0x110] sm:$0xff]  ;;  %v1599_v53 = vld [vmem:[%s2150_s6] sm:$0xff] }
  0x25   :  { %175 = vmatpush.msra.mxu1 %v99_v27  ;;  %285 = vmatpush.msra.mxu3 %v1136_v37  ;;  %v1604_v54 = vld [vmem:[%s2150_s6 + $0x8] sm:$0xff]  ;;  %v1132_v55 = vld [vmem:[%s2149_s8 + $0x230] sm:$0xff]  ;;  %v1078_v56 = vld [vmem:[%s2149_s8 + $0x80] sm:$0xff]  ;;  %v129_v58 = vrot.slane %v1599_v53, 2  ;;  %v208_v63 = vrot.slane %v1599_v53, 3  ;;  %v160_v2 = vrot.slane %v1599_v53, 1 }
  0x26   :  { %145 = vmatpush.msra.mxu0 %v1084_v30  ;;  %223 = vmatpush.msra.mxu2 %v1101_v32  ;;  %v92_v57 = vld [vmem:[%s2149_s8] sm:$0xff]  ;;  %v130_v59 = vrot.slane %v1604_v54, 2  ;;  %v1125_v60 = vld [vmem:[%s2149_s8 + $0x1f8] sm:$0xff]  ;;  %v1095_v62 = vld [vmem:[%s2149_s8 + $0x108] sm:$0xff]  ;;  %v209_v0 = vrot.slane %v1604_v54, 3  ;;  %v161_v3 = vrot.slane %v1604_v54, 1 }
  0x27   :  { %176 = vmatpush.msra.mxu1 %v98_v31  ;;  %286 = vmatpush.msra.mxu3 %v1135_v41  ;;  %v1157_v61 = vld [vmem:[%s2149_s8 + $0x2f8] sm:$0xff]  ;;  %v1131_v1 = vld [vmem:[%s2149_s8 + $0x228] sm:$0xff]  ;;  %v1124_v4 = vld [vmem:[%s2149_s8 + $0x1f0] sm:$0xff] }
  0x28   :  { %146 = vmatpush.msra.mxu0 %v1083_v34  ;;  %224 = vmatpush.msra.mxu2 %v1100_v36  ;;  %v1156_v5 = vld [vmem:[%s2149_s8 + $0x2f0] sm:$0xff]  ;;  %v1123_v7 = vld [vmem:[%s2149_s8 + $0x1e8] sm:$0xff]  ;;  %v1094_v9 = vld [vmem:[%s2149_s8 + $0x100] sm:$0xff]  ;;  %v131_v10 = vsel %vm128_vm0, %v129_v58, %v130_v59  ;;  %v210_v14 = vsel %vm207_vm1, %v208_v63, %v209_v0  ;;  %v162_v15 = vsel %vm159_vm2, %v160_v2, %v161_v3 }
  0x29   :  { %177 = vmatpush.msra.mxu1 %v97_v35  ;;  %287 = vmatpush.msra.mxu3 %v1134_v45  ;;  %v1642_v6 = vld [vmem:[%s2150_s6 + $0x10] sm:$0xf]  ;;  %v1155_v8 = vld [vmem:[%s2149_s8 + $0x2e8] sm:$0xff]  ;;  %v1122_v12 = vld [vmem:[%s2149_s8 + $0x1e0] sm:$0xff] }
  0x2a   :  { %147 = vmatpush.msra.mxu0 %v1082_v38  ;;  %225 = vmatpush.msra.mxu2 %v1099_v40  ;;  %v132_v11 = vrot.slane %v1642_v6, 2  ;;  %v1154_v13 = vld [vmem:[%s2149_s8 + $0x2e0] sm:$0xff]  ;;  %v1121_v17 = vld [vmem:[%s2149_s8 + $0x1d8] sm:$0xff] }
  0x2b   :  { %178 = vmatpush.msra.mxu1 %v96_v39  ;;  %288 = vmatpush.msra.mxu3 %v1133_v49  ;;  %v1130_v16 = vld [vmem:[%s2149_s8 + $0x220] sm:$0xff]  ;;  %v1153_v18 = vld [vmem:[%s2149_s8 + $0x2d8] sm:$0xff] }
  0x2c   :  { %148 = vmatpush.msra.mxu0 %v1081_v42  ;;  %226 = vmatpush.msra.mxu2 %v1098_v44 }
  0x2d   :  { %179 = vmatpush.msra.mxu1 %v95_v43  ;;  %289 = vmatpush.msra.mxu3 %v1132_v55 }
  0x2e   :  { %149 = vmatpush.msra.mxu0 %v1080_v46  ;;  %227 = vmatpush.msra.mxu2 %v1097_v48 }
  0x2f   :  { %180 = vmatpush.msra.mxu1 %v94_v47  ;;  %290 = vmatpush.msra.mxu3 %v1131_v1 }
  0x30   :  { %150 = vmatpush.msra.mxu0 %v1079_v50  ;;  %228 = vmatpush.msra.mxu2 %v1096_v52 }
  0x31   :  { %181 = vmatpush.msra.mxu1 %v93_v51 }
  0x32   :  { %151 = vmatpush.msra.mxu0 %v1078_v56  ;;  %229 = vmatpush.msra.mxu2 %v1095_v62 }
  0x33   :  { %182 = vmatpush.msra.mxu1 %v92_v57  ;;  %152 = vmatmul.f32.vlgmr.msra.gmra.mxu0 %v131_v10 }
  0x34   :  { %303 = vmatpush.msrb.mxu0 %v1125_v60  ;;  %230 = vmatpush.msra.mxu2 %v1094_v9 }
  0x35   :  { %351 = vmatpush.msrb.mxu1 %v1157_v61  ;;  %231 = vmatmul.f32.vlgmr.msra.gmra.mxu2 %v210_v14 }
  0x36   :  { %304 = vmatpush.msrb.mxu0 %v1124_v4  ;;  %183 = vmatmul.f32.vlgmr.msra.gmra.mxu1 %v162_v15 }
  0x37   :  { %352 = vmatpush.msrb.mxu1 %v1156_v5 }
  0x38   :  { %305 = vmatpush.msrb.mxu0 %v1123_v7 }
  0x39   :  { %353 = vmatpush.msrb.mxu1 %v1155_v8 }
  0x3a   :  { %34 = vsyncpa [#allocation5], 0  ;;  %306 = vmatpush.msrb.mxu0 %v1122_v12  ;;  %v1129_v19 = vld [vmem:[%s2149_s8 + $0x218] sm:$0xff]  ;;  %v211_v20 = vrot.slane %v1642_v6, 3  ;;  %v1120_v21 = vld [vmem:[%s2149_s8 + $0x1d0] sm:$0xff]  ;;  %291 = vmatpush.msra.mxu3 %v1130_v16  ;;  %v133_v24 = vsel %vm128_vm0, %v130_v59, %v132_v11  ;;  %v163_v25 = vrot.slane %v1642_v6, 1 }
  0x3b   :  { %354 = vmatpush.msrb.mxu1 %v1154_v13  ;;  %v1152_v22 = vld [vmem:[%s2149_s8 + $0x2d0] sm:$0xff]  ;;  %v1119_v26 = vld [vmem:[%s2149_s8 + $0x1c8] sm:$0xff]  ;;  %v1118_v30 = vld [vmem:[%s2149_s8 + $0x1c0] sm:$0xff]  ;;  %155 = vmatmul.f32.gmra.mxu0 %v133_v24  ;;  %v344_v46 = vrot.slane %v1599_v53, 4  ;;  %v345_v47 = vrot.slane %v1604_v54, 4  ;;  %vm343_vm3 = vcmask 1043456  }
  0x3c   :  { %307 = vmatpush.msrb.mxu0 %v1121_v17  ;;  %v1128_v23 = vld [vmem:[%s2149_s8 + $0x210] sm:$0xff]  ;;  %v1151_v27 = vld [vmem:[%s2149_s8 + $0x2c8] sm:$0xff]  ;;  %292 = vmatpush.msra.mxu3 %v1129_v19  ;;  %v212_v28 = vsel %vm207_vm1, %v209_v0, %v211_v20  ;;  %v1150_v31 = vld [vmem:[%s2149_s8 + $0x2c0] sm:$0xff]  ;;  %v164_v32 = vsel %vm159_vm2, %v161_v3, %v163_v25  ;;  %v347_v55 = vrot.slane %v1642_v6, 4  ;;  %s2151_s0 = sld [smem:[#allocation14_spill]]  ;;  %vm411_vm4 = vcmask 785408  }
  0x3d   :  { %355 = vmatpush.msrb.mxu1 %v1153_v18  ;;  %v1127_v29 = vld [vmem:[%s2149_s8 + $0x208] sm:$0xff]  ;;  %v1126_v33 = vld [vmem:[%s2149_s8 + $0x200] sm:$0xff]  ;;  %v1117_v34 = vld [vmem:[%s2149_s8 + $0x1b8] sm:$0xff]  ;;  %234 = vmatmul.f32.gmra.mxu2 %v212_v28  ;;  %v346_v52 = vsel %vm343_vm3, %v344_v46, %v345_v47  ;;  %s2152_s6 = sld [smem:[#allocation11_spill]]  ;;  %vm445_vm5 = vcmask 130048   ;;  %vm572_vm6 = vcmask 441344  }
  0x3e   :  { %308 = vmatpush.msrb.mxu0 %v1120_v21  ;;  %293 = vmatpush.msra.mxu3 %v1128_v23  ;;  %v1149_v35 = vld [vmem:[%s2149_s8 + $0x2b8] sm:$0xff]  ;;  %v1116_v36 = vld [vmem:[%s2149_s8 + $0x1b0] sm:$0xff]  ;;  %v1115_v38 = vld [vmem:[%s2149_s8 + $0x1a8] sm:$0xff]  ;;  %v348_v56 = vsel %vm343_vm3, %v345_v47, %v347_v55  ;;  %s2153_s30 = sld [smem:[#allocation12_spill]]  ;;  %vm742_vm7 = vcmask 1041408   ;;  %vm735_vm8 = vcmask 277504  }
  0x3f   :  { %356 = vmatpush.msrb.mxu1 %v1152_v22  ;;  %v1148_v37 = vld [vmem:[%s2149_s8 + $0x2b0] sm:$0xff]  ;;  %v1147_v39 = vld [vmem:[%s2149_s8 + $0x2a8] sm:$0xff]  ;;  %v1114_v40 = vld [vmem:[%s2149_s8 + $0x1a0] sm:$0xff]  ;;  %s2154_s28 = sld [smem:[#allocation13_spill]]  ;;  %vm815_vm9 = vcmask 1040384   ;;  %vm808_vm10 = vcmask 203776  }
  0x40   :  { %309 = vmatpush.msrb.mxu0 %v1119_v26  ;;  %294 = vmatpush.msra.mxu3 %v1127_v29  ;;  %v1146_v41 = vld [vmem:[%s2149_s8 + $0x2a0] sm:$0xff]  ;;  %v1113_v42 = vld [vmem:[%s2149_s8 + $0x198] sm:$0xff]  ;;  %v1112_v44 = vld [vmem:[%s2149_s8 + $0x190] sm:$0xff]  ;;  %s2155_s29 = sld [smem:[#allocation16_spill]]  ;;  %vm1000_vm11 = vcmask 982016   ;;  %s1050_s1 = sshll.u32 %s2127_s26, 4  ;;  %s1051_s1 = int_to_ptr.hbm [resolvable:$true] %s1050_s1 }
  0x41   :  { %357 = vmatpush.msrb.mxu1 %v1151_v27  ;;  %v1145_v43 = vld [vmem:[%s2149_s8 + $0x298] sm:$0xff]  ;;  %v1144_v45 = vld [vmem:[%s2149_s8 + $0x290] sm:$0xff]  ;;  %v1111_v48 = vld [vmem:[%s2149_s8 + $0x188] sm:$0xff]  ;;  %s2156_s5 = sld [smem:[#allocation9_spill]]  ;;  %s1294_s2 = smov 128   ;;  %vm1030_vm12 = vcmask 39936  }
  0x42   :  { %310 = vmatpush.msrb.mxu0 %v1118_v30  ;;  %186 = vmatmul.f32.gmra.mxu1 %v164_v32  ;;  %v1143_v49 = vld [vmem:[%s2149_s8 + $0x288] sm:$0xff]  ;;  %v1110_v50 = vld [vmem:[%s2149_s8 + $0x180] sm:$0xff]  ;;  %v410_v57 = vld [vmem:[%s2151_s0 + $0x58] sm:$0xff]  ;;  %s2157_s7 = sld [smem:[#allocation19_spill]]  ;;  %vm1042_vm13 = vcmask 32768  }
  0x43   :  { %358 = vmatpush.msrb.mxu1 %v1150_v31  ;;  %295 = vmatpush.msra.mxu3 %v1126_v33  ;;  %v1142_v51 = vld [vmem:[%s2149_s8 + $0x280] sm:$0xff]  ;;  %v409_v58 = vld [vmem:[%s2151_s0 + $0x50] sm:$0xff]  ;;  %v1174_v59 = vld [vmem:[%s2151_s0 + $0xb8] sm:$0xff]  ;;  %s2160_s8 = sld [smem:[#allocation18_spill]] }
  0x44   :  { %311 = vmatpush.msrb.mxu0 %v1117_v34  ;;  %296 = vmatmul.f32.vlgmr.msra.gmra.mxu3 %v131_v10  ;;  %v407_v60 = vld [vmem:[%s2151_s0 + $0x40] sm:$0xff]  ;;  %v1172_v61 = vld [vmem:[%s2151_s0 + $0xa8] sm:$0xff]  ;;  %v406_v62 = vld [vmem:[%s2151_s0 + $0x38] sm:$0xff] }
  0x45   :  { %359 = vmatpush.msrb.mxu1 %v1149_v35  ;;  %422 = vmatpush.msrb.mxu2 %v410_v57  ;;  %v1171_v63 = vld [vmem:[%s2151_s0 + $0xa0] sm:$0xff]  ;;  %v405_v0 = vld [vmem:[%s2151_s0 + $0x30] sm:$0xff]  ;;  %v1170_v1 = vld [vmem:[%s2151_s0 + $0x98] sm:$0xff] }
  0x46   :  { %312 = vmatpush.msrb.mxu0 %v1116_v36  ;;  %508 = vmatpush.msrb.mxu3 %v1174_v59  ;;  %v404_v2 = vld [vmem:[%s2151_s0 + $0x28] sm:$0xff]  ;;  %v1169_v3 = vld [vmem:[%s2151_s0 + $0x90] sm:$0xff]  ;;  %v403_v4 = vld [vmem:[%s2151_s0 + $0x20] sm:$0xff] }
  0x47   :  { %360 = vmatpush.msrb.mxu1 %v1148_v37  ;;  %423 = vmatpush.msrb.mxu2 %v409_v58  ;;  %v1168_v5 = vld [vmem:[%s2151_s0 + $0x88] sm:$0xff]  ;;  %v402_v6 = vld [vmem:[%s2151_s0 + $0x18] sm:$0xff]  ;;  %v1167_v7 = vld [vmem:[%s2151_s0 + $0x80] sm:$0xff] }
  0x48   :  { %313 = vmatpush.msrb.mxu0 %v1115_v38  ;;  %v401_v8 = vld [vmem:[%s2151_s0 + $0x10] sm:$0xff]  ;;  %v1166_v9 = vld [vmem:[%s2151_s0 + $0x78] sm:$0xff]  ;;  %v400_v10 = vld [vmem:[%s2151_s0 + $0x8] sm:$0xff] }
  0x49   :  { %361 = vmatpush.msrb.mxu1 %v1147_v39  ;;  %v1165_v11 = vld [vmem:[%s2151_s0 + $0x70] sm:$0xff]  ;;  %v399_v12 = vld [vmem:[%s2151_s0] sm:$0xff]  ;;  %v1164_v13 = vld [vmem:[%s2151_s0 + $0x68] sm:$0xff] }
  0x4a   :  { %314 = vmatpush.msrb.mxu0 %v1114_v40  ;;  %v1163_v15 = vld [vmem:[%s2151_s0 + $0x60] sm:$0xff] }
  0x4b   :  { %362 = vmatpush.msrb.mxu1 %v1146_v41  ;;  %v1227_v23 = vld [vmem:[%s2152_s6] ss:$0 sm:$0xff]  ;;  %v1228_v29 = vld [vmem:[%s2152_s6 + $0x1] ss:$0 sm:$0xff]  ;;  %s1295_s6 = smov 8  }
  0x4c   :  { %315 = vmatpush.msrb.mxu0 %v1113_v42  ;;  %299 = vmatmul.f32.gmra.mxu3 %v133_v24  ;;  %v1229_v35 = vld [vmem:[%s2153_s30] ss:$0 sm:$0xff] }
  0x4d   :  { %363 = vmatpush.msrb.mxu1 %v1145_v43  ;;  %v1230_v39 = vld [vmem:[%s2154_s28] ss:$0 sm:$0xff]  ;;  %s2158_s28 = sld [smem:[#allocation15_spill]] }
  0x4e   :  { %316 = vmatpush.msrb.mxu0 %v1112_v44 }
  0x4f   :  { %364 = vmatpush.msrb.mxu1 %v1144_v45 }
  0x50   :  { %317 = vmatpush.msrb.mxu0 %v1111_v48 }
  0x51   :  { %365 = vmatpush.msrb.mxu1 %v1143_v49 }
  0x52   :  { %318 = vmatpush.msrb.mxu0 %v1110_v50 }
  0x53   :  { %366 = vmatpush.msrb.mxu1 %v1142_v51  ;;  %319 = vmatmul.f32.vlgmr.msrb.gmra.mxu0 %v1599_v53  ;;  %v408_v53 = vld [vmem:[%s2151_s0 + $0x48] sm:$0xff] }
  0x54   :  { %367 = vmatmul.f32.vlgmr.msrb.gmra.mxu1 %v346_v52  ;;  %424 = vmatpush.msrb.mxu2 %v408_v53 }
  0x56   :  { %425 = vmatpush.msrb.mxu2 %v407_v60  ;;  %v562_v60 = vld [vmem:[%s2155_s29 + $0x28] sm:$0xff] }
  0x58   :  { %426 = vmatpush.msrb.mxu2 %v406_v62  ;;  %v560_v62 = vld [vmem:[%s2155_s29 + $0x18] sm:$0xff] }
  0x5a   :  { %427 = vmatpush.msrb.mxu2 %v405_v0 }
  0x5b   :  { %322 = vmatmul.f32.gmra.mxu0 %v1604_v54  ;;  %v1173_v54 = vld [vmem:[%s2151_s0 + $0xb0] sm:$0xff]  ;;  %s1296_s0 = smov [#allocation4]  }
  0x5c   :  { %370 = vmatmul.f32.gmra.mxu1 %v348_v56  ;;  %509 = vmatpush.msrb.mxu3 %v1173_v54  ;;  %v563_v54 = vld [vmem:[%s2155_s29 + $0x30] sm:$0x3f] }
  0x5d   :  { %428 = vmatpush.msrb.mxu2 %v404_v2  ;;  %1190 = vmatpush.msk.msra.mxu1 %vm128_vm0, %v563_v54  ;;  %v725_v54 = vld [vmem:[%s2121_s20] sm:$0xff] }
  0x5e   :  { %510 = vmatpush.msrb.mxu3 %v1172_v61  ;;  %v561_v61 = vld [vmem:[%s2155_s29 + $0x20] sm:$0xff] }
  0x5f   :  { %429 = vmatpush.msrb.mxu2 %v403_v4  ;;  %624 = vmatpush.msra.mxu1 %v562_v60  ;;  %v1867_v4 = vld [vmem:[%s2156_s5] sm:$0xff] }
  0x60   :  { %511 = vmatpush.msrb.mxu3 %v1171_v63  ;;  %v1235_v60 = vld [vmem:[%s2115_s14] ss:$0 sm:$0xff] }
  0x61   :  { %430 = vmatpush.msrb.mxu2 %v402_v6  ;;  %625 = vmatpush.msra.mxu1 %v561_v61  ;;  %v1184_v6 = vld [vmem:[%s2155_s29 + $0x58] sm:$0xff] }
  0x62   :  { %512 = vmatpush.msrb.mxu3 %v1170_v1 }
  0x63   :  { %431 = vmatpush.msrb.mxu2 %v401_v8  ;;  %626 = vmatpush.msra.mxu1 %v560_v62  ;;  %v1886_v8 = vld [vmem:[%s2156_s5 + $0x8] sm:$0xff] }
  0x64   :  { %513 = vmatpush.msrb.mxu3 %v1169_v3  ;;  %v1186_v3 = vld [vmem:[%s2155_s29 + $0x68] sm:$0x3f] }
  0x65   :  { %432 = vmatpush.msrb.mxu2 %v400_v10  ;;  %v559_v10 = vld [vmem:[%s2155_s29 + $0x10] sm:$0xff] }
  0x66   :  { %514 = vmatpush.msrb.mxu3 %v1168_v5  ;;  %v1185_v5 = vld [vmem:[%s2155_s29 + $0x60] sm:$0xff]  ;;  %627 = vmatpush.msra.mxu1 %v559_v10 }
  0x67   :  { %433 = vmatpush.msrb.mxu2 %v399_v12  ;;  %v558_v12 = vld [vmem:[%s2155_s29 + $0x8] sm:$0xff] }
  0x68   :  { %515 = vmatpush.msrb.mxu3 %v1167_v7  ;;  %v1183_v7 = vld [vmem:[%s2155_s29 + $0x50] sm:$0xff]  ;;  %628 = vmatpush.msra.mxu1 %v558_v12 }
  0x69   :  { %v876_v12 = vld [vmem:[%s2114_s13 + $0x10] sm:$0xff] }
  0x6a   :  { %516 = vmatpush.msrb.mxu3 %v1166_v9  ;;  %v1182_v9 = vld [vmem:[%s2155_s29 + $0x48] sm:$0xff] }
  0x6c   :  { %517 = vmatpush.msrb.mxu3 %v1165_v11  ;;  %v1181_v11 = vld [vmem:[%s2155_s29 + $0x40] sm:$0xff] }
  0x6e   :  { %518 = vmatpush.msrb.mxu3 %v1164_v13  ;;  %v1180_v13 = vld [vmem:[%s2155_s29 + $0x38] sm:$0xff] }
  0x70   :  { %519 = vmatpush.msrb.mxu3 %v1163_v15  ;;  %v657_v15 = vld [vmem:[%s2157_s7 + $0x30] sm:$0x3f] }
  0xb0   :  { %v153_v14 = vpop.f32.mrf.mxu0 }
  0xb3   :  { %v184_v16 = vpop.f32.mrf.mxu1 }
  0xb4   :  { %v185_v20 = vadd.f32 %v184_v16, %v153_v14  ;;  %v557_v14 = vld [vmem:[%s2155_s29] sm:$0xff]  ;;  %v656_v16 = vld [vmem:[%s2157_s7 + $0x28] sm:$0xff]  ;;  %s2159_s29 = sld [smem:[#allocation17_spill]] }
  0xb5   :  { %629 = vmatpush.msra.mxu1 %v557_v14  ;;  %v875_v14 = vld [vmem:[%s2114_s13 + $0x8] sm:$0xff] }
  0xb8   :  { %v156_v17 = vpop.f32.mrf.mxu0  ;;  %v232_v18 = vpop.f32.mrf.mxu2 }
  0xb9   :  { %v238_v22 = vadd.f32 %v232_v18, %v185_v20  ;;  %v1231_v18 = vld [vmem:[%s2158_s28] ss:$0 sm:$0xff] }
  0xbb   :  { %v244_v26 = vadd.f32 %v1227_v23, %v238_v22  ;;  %v1232_v22 = vld [vmem:[%s2158_s28 + $0x1] ss:$0 sm:$0xff] }
  0xbd   :  { %v385_v32 = vmax.f32 %v244_v26, 0.0 }
  0xbf   :  { %v187_v19 = vpop.f32.mrf.mxu1 }
  0xc0   :  { %v188_v27 = vadd.f32 %v187_v19, %v156_v17  ;;  %v235_v30 = vpop.f32.mrf.mxu2  ;;  %v655_v17 = vld [vmem:[%s2157_s7 + $0x20] sm:$0xff] }
  0xc2   :  { %v239_v33 = vadd.f32 %v235_v30, %v188_v27 }
  0xc4   :  { %v245_v42 = vadd.f32 %v1227_v23, %v239_v33  ;;  %v653_v33 = vld [vmem:[%s2157_s7 + $0x10] sm:$0xff] }
  0xc6   :  { %v386_v49 = vmax.f32 %v245_v42, 0.0 }
  0xc7   :  { %v297_v21 = vpop.f32.mrf.mxu3 }
  0xcf   :  { %v300_v36 = vpop.f32.mrf.mxu3 }
  0xd0   :  { %v320_v24 = vpop.f32.mrf.mxu0 }
  0xd1   :  { %v368_v25 = vpop.f32.mrf.mxu1  ;;  %v321_v28 = vadd.f32 %v320_v24, %v297_v21 }
  0xd3   :  { %v374_v31 = vadd.f32 %v368_v25, %v321_v28 }
  0xd5   :  { %v381_v34 = vadd.f32 %v1228_v29, %v374_v31 }
  0xd7   :  { %v387_v37 = vadd.f32 %v385_v32, %v381_v34  ;;  %v477_v38 = vmax.f32 %v381_v34, 0.0  ;;  %v654_v32 = vld [vmem:[%s2157_s7 + $0x18] sm:$0xff]  ;;  %v652_v34 = vld [vmem:[%s2157_s7 + $0x8] sm:$0xff] }
  0xd8   :  { %v323_v40 = vpop.f32.mrf.mxu0 }
  0xd9   :  { %v371_v41 = vpop.f32.mrf.mxu1  ;;  %v392_v43 = vmul.f32 %v1229_v35, %v387_v37  ;;  %v479_v44 = vadd.f32 %v477_v38, %v244_v26  ;;  %v324_v45 = vadd.f32 %v323_v40, %v300_v36  ;;  %v1233_v37 = vld [vmem:[%s2159_s29] ss:$0 sm:$0xff] }
  0xda   :  { %v1234_v40 = vld [vmem:[%s2160_s8] ss:$0 sm:$0xff] }
  0xdb   :  { %v481_v46 = vmul.f32 %v1229_v35, %v479_v44  ;;  %v375_v47 = vadd.f32 %v371_v41, %v324_v45  ;;  %v397_v48 = vadd.f32 %v1230_v39, %v392_v43 }
  0xdd   :  { %v382_v50 = vadd.f32 %v1228_v29, %v375_v47  ;;  %1159 = vmatmul.msk.f32.vlgmr.msrb.gmra.mxu2 %vm411_vm4, %v397_v48  ;;  %v483_v51 = vadd.f32 %v1230_v39, %v481_v46  ;;  %v734_v48 = vld [vmem:[%s2113_s12 + $0x20] sm:$0x3] }
  0xde   :  { %1218 = vmatpush.msk.msrb.mxu1 %vm742_vm7, %v734_v48 }
  0xdf   :  { %v388_v52 = vadd.f32 %v386_v49, %v382_v50  ;;  %v478_v55 = vmax.f32 %v382_v50, 0.0  ;;  %1175 = vmatmul.msk.f32.vlgmr.msrb.gmra.mxu3 %vm411_vm4, %v483_v51  ;;  %v733_v49 = vld [vmem:[%s2113_s12 + $0x18] sm:$0xff] }
  0xe0   :  { %1219 = vmatpush.msrb.mxu1 %v733_v49 }
  0xe1   :  { %v480_v56 = vadd.f32 %v478_v55, %v245_v42  ;;  %v393_v57 = vmul.f32 %v1229_v35, %v388_v52  ;;  %v729_v52 = vld [vmem:[%s2121_s20 + $0x20] sm:$0x3]  ;;  %v732_v55 = vld [vmem:[%s2113_s12 + $0x10] sm:$0xff] }
  0xe2   :  { %1220 = vmatpush.msrb.mxu1 %v732_v55 }
  0xe3   :  { %v398_v58 = vadd.f32 %v1230_v39, %v393_v57  ;;  %v482_v59 = vmul.f32 %v1229_v35, %v480_v56  ;;  %v651_v35 = vld [vmem:[%s2157_s7] sm:$0xff]  ;;  %v728_v56 = vld [vmem:[%s2121_s20 + $0x18] sm:$0xff]  ;;  %v731_v57 = vld [vmem:[%s2113_s12 + $0x8] sm:$0xff] }
  0xe4   :  { %1221 = vmatpush.msrb.mxu1 %v731_v57 }
  0xe5   :  { %1160 = vmatmul.msk.f32.gmra.mxu2 %vm411_vm4, %v398_v58  ;;  %v484_v53 = vadd.f32 %v1230_v39, %v482_v59  ;;  %v727_v58 = vld [vmem:[%s2121_s20 + $0x10] sm:$0xff]  ;;  %v730_v59 = vld [vmem:[%s2113_s12] sm:$0xff]  ;;  %s1062_s12 = sshll.u32 %s1296_s0, 4  ;;  %s1063_s12 = int_to_ptr.vmem [resolvable:$true] %s1062_s12 }
  0xe6   :  { %1222 = vmatpush.msrb.mxu1 %v730_v59 }
  0xe7   :  { %1176 = vmatmul.msk.f32.gmra.mxu3 %vm411_vm4, %v484_v53  ;;  %v726_v53 = vld [vmem:[%s2121_s20 + $0x8] sm:$0xff] }
 0x160   :  { %v435_v63 = vpop.f32.mrf.mxu2 }
 0x162   :  { %v521_v0 = vpop.f32.mrf.mxu3 }
 0x168   :  { %v438_v1 = vpop.f32.mrf.mxu2 }
 0x169   :  { %466 = vmatpush.msra.mxu0 %v438_v1 }
 0x16a   :  { %v524_v2 = vpop.f32.mrf.mxu3 }
 0x16b   :  { %467 = vmatpush.msra.mxu0 %v435_v63  ;;  %546 = vmatpush.msra.mxu2 %v524_v2  ;;  %v1236_v63 = vld [vmem:[%s2118_s17] ss:$0 sm:$0xff] }
 0x16c   :  { %1161 = vmatmul.msk.f32.vlgmr.msra.gmra.mxu0 %vm445_vm5, %v1867_v4 }
 0x16d   :  { %547 = vmatpush.msra.mxu2 %v521_v0  ;;  %1187 = vmatpush.msk.msrb.mxu0 %vm128_vm0, %v1186_v3 }
 0x16e   :  { %1178 = vmatmul.msk.f32.vlgmr.msra.gmra.mxu2 %vm445_vm5, %v1867_v4 }
 0x16f   :  { %592 = vmatpush.msrb.mxu0 %v1185_v5  ;;  %1193 = vmatpush.msk.msrb.mxu2 %vm128_vm0, %v657_v15  ;;  %v805_v15 = vld [vmem:[%s2122_s21 + $0x8] sm:$0xff] }
 0x171   :  { %593 = vmatpush.msrb.mxu0 %v1184_v6  ;;  %677 = vmatpush.msrb.mxu2 %v656_v16  ;;  %v874_v16 = vld [vmem:[%s2114_s13] sm:$0xff] }
 0x173   :  { %594 = vmatpush.msrb.mxu0 %v1183_v7  ;;  %678 = vmatpush.msrb.mxu2 %v655_v17  ;;  %v877_v7 = vld [vmem:[%s2114_s13 + $0x18] sm:$0x1]  ;;  %v804_v17 = vld [vmem:[%s2122_s21] sm:$0xff]  ;;  %s1064_s13 = sshll.u32 %s2128_s27, 4  ;;  %s1065_s13 = int_to_ptr.hbm [resolvable:$true] %s1064_s13 }
 0x174   :  { %1162 = vmatmul.msk.f32.gmra.mxu0 %vm445_vm5, %v1886_v8 }
 0x175   :  { %595 = vmatpush.msrb.mxu0 %v1182_v9  ;;  %679 = vmatpush.msrb.mxu2 %v654_v32  ;;  %v999_v32 = vld [vmem:[%s2125_s24 + $0x70] sm:$0xff] }
 0x176   :  { %1179 = vmatmul.msk.f32.gmra.mxu2 %vm445_vm5, %v1886_v8 }
 0x177   :  { %596 = vmatpush.msrb.mxu0 %v1181_v11  ;;  %680 = vmatpush.msrb.mxu2 %v653_v33  ;;  %v807_v11 = vld [vmem:[%s2122_s21 + $0x18] sm:$0x1] }
 0x178   :  { %v996_v33 = vld [vmem:[%s2125_s24 + $0x58] sm:$0xff] }
 0x179   :  { %597 = vmatpush.msrb.mxu0 %v1180_v13  ;;  %681 = vmatpush.msrb.mxu2 %v652_v34  ;;  %v806_v13 = vld [vmem:[%s2122_s21 + $0x10] sm:$0xff] }
 0x17a   :  { %v995_v34 = vld [vmem:[%s2125_s24 + $0x50] sm:$0xff] }
 0x17b   :  { %682 = vmatpush.msrb.mxu2 %v651_v35  ;;  %1198 = vmatpush.msk.msra.mxu0 %vm742_vm7, %v734_v48  ;;  %v994_v35 = vld [vmem:[%s2125_s24 + $0x48] sm:$0xff] }
 0x17d   :  { %758 = vmatpush.msra.mxu0 %v733_v49  ;;  %1203 = vmatpush.msk.msra.mxu2 %vm815_vm9, %v807_v11 }
 0x17f   :  { %759 = vmatpush.msra.mxu0 %v732_v55  ;;  %832 = vmatpush.msra.mxu2 %v806_v13  ;;  %v986_v55 = vld [vmem:[%s2125_s24 + $0x8] sm:$0xff] }
 0x181   :  { %760 = vmatpush.msra.mxu0 %v731_v57  ;;  %833 = vmatpush.msra.mxu2 %v805_v15 }
 0x183   :  { %761 = vmatpush.msra.mxu0 %v730_v59  ;;  %834 = vmatpush.msra.mxu2 %v804_v17  ;;  %v978_v59 = vld [vmem:[%s2124_s23] sm:$0x1]  ;;  %s1293_s23 = smov [#allocation2]  }
 0x184   :  { %s1048_s11 = sshll.u32 %s1293_s23, 4  ;;  %s1049_s11 = int_to_ptr.vmem [resolvable:$true] %s1048_s11 }
 0x1e9   :  { %v469_v19 = vpop.f32.mrf.mxu0 }
 0x1ea   :  { %v470_v20 = vadd.f32 %v1231_v18, %v469_v19 }
 0x1ec   :  { %v475_v21 = vmax.f32 %v470_v20, 0.0 }
 0x1ee   :  { %1191 = vmatmul.msk.f32.vlgmr.msra.gmra.mxu1 %vm572_vm6, %v475_v21  ;;  %v1238_v21 = vld [vmem:[%s2119_s18] ss:$0 sm:$0xff] }
 0x1f1   :  { %v549_v23 = vpop.f32.mrf.mxu2  ;;  %v472_v24 = vpop.f32.mrf.mxu0 }
 0x1f2   :  { %v550_v25 = vadd.f32 %v1232_v22, %v549_v23  ;;  %v473_v26 = vadd.f32 %v1231_v18, %v472_v24  ;;  %v1237_v18 = vld [vmem:[%s2116_s15] ss:$0 sm:$0xff] }
 0x1f4   :  { %v555_v27 = vmax.f32 %v550_v25, 0.0  ;;  %v476_v28 = vmax.f32 %v473_v26, 0.0 }
 0x1f6   :  { %1188 = vmatmul.msk.f32.vlgmr.msrb.gmra.mxu0 %vm572_vm6, %v555_v27  ;;  %1192 = vmatmul.msk.f32.gmra.mxu1 %vm572_vm6, %v476_v28 }
 0x1f7   :  { %1209 = vmatpush.msk.msrb.mxu0 %vm815_vm9, %v877_v7 }
 0x1f9   :  { %v552_v29 = vpop.f32.mrf.mxu2  ;;  %900 = vmatpush.msrb.mxu0 %v876_v12 }
 0x1fa   :  { %v553_v30 = vadd.f32 %v1232_v22, %v552_v29 }
 0x1fb   :  { %901 = vmatpush.msrb.mxu0 %v875_v14 }
 0x1fc   :  { %v556_v31 = vmax.f32 %v553_v30, 0.0  ;;  %v946_v30 = vld [vmem:[%s2123_s22 + $0x8] sm:$0xff] }
 0x1fd   :  { %902 = vmatpush.msrb.mxu0 %v874_v16 }
 0x1fe   :  { %1189 = vmatmul.msk.f32.gmra.mxu0 %vm572_vm6, %v556_v31  ;;  %v945_v31 = vld [vmem:[%s2123_s22] sm:$0xff] }
 0x26b   :  { %v631_v36 = vpop.f32.mrf.mxu1 }
 0x273   :  { %v599_v38 = vpop.f32.mrf.mxu0  ;;  %v634_v43 = vpop.f32.mrf.mxu1 }
 0x274   :  { %v632_v39 = vadd.f32 %v631_v36, %v599_v38  ;;  %v993_v36 = vld [vmem:[%s2125_s24 + $0x40] sm:$0xff] }
 0x275   :  { %v1239_v38 = vld [vmem:[%s2117_s16] ss:$0 sm:$0xff] }
 0x276   :  { %v641_v41 = vmul.f32 %v1233_v37, %v632_v39  ;;  %v991_v39 = vld [vmem:[%s2125_s24 + $0x30] sm:$0xff] }
 0x278   :  { %v647_v42 = vadd.f32 %v1234_v40, %v641_v41 }
 0x27a   :  { %649 = vst.msk [vmem:[#allocation2] sm:$0xff] %vm572_vm6, %v647_v42  ;;  %1194 = vmatmul.msk.f32.vlgmr.msrb.gmra.mxu2 %vm572_vm6, %v647_v42 }
 0x27b   :  { %v602_v44 = vpop.f32.mrf.mxu0  ;;  %967 = vmatpush.msrb.mxu2 %v946_v30 }
 0x27c   :  { %v635_v45 = vadd.f32 %v634_v43, %v602_v44  ;;  %v1240_v43 = vld [vmem:[%s2120_s19] ss:$0 sm:$0xff] }
 0x27d   :  { %968 = vmatpush.msrb.mxu2 %v945_v31  ;;  %v989_v44 = vld [vmem:[%s2125_s24 + $0x20] sm:$0xff] }
 0x27e   :  { %v642_v46 = vmul.f32 %v1233_v37, %v635_v45  ;;  %v992_v37 = vld [vmem:[%s2125_s24 + $0x38] sm:$0xff] }
 0x280   :  { %v648_v47 = vadd.f32 %v1234_v40, %v642_v46  ;;  %v990_v40 = vld [vmem:[%s2125_s24 + $0x28] sm:$0xff]  ;;  %v988_v46 = vld [vmem:[%s2125_s24 + $0x18] sm:$0xff] }
 0x282   :  { %650 = vst.msk [vmem:[#allocation2 + $0x8] sm:$0xff] %vm572_vm6, %v648_v47  ;;  %1195 = vmatmul.msk.f32.gmra.mxu2 %vm572_vm6, %v648_v47 }
 0x283   :  { %1056 = dma.vmem_to_hbm [thread:$0]  %s1049_s11, 256, %s1051_s1, [#allocation3], %s1294_s2, %s1294_s2, %s1295_s6  }
 0x2fd   :  { %v684_v50 = vpop.f32.mrf.mxu2 }
 0x305   :  { %v687_v51 = vpop.f32.mrf.mxu2 }
 0x306   :  { %708 = vmatpush.msra.mxu3 %v687_v51 }
 0x308   :  { %709 = vmatpush.msra.mxu3 %v684_v50 }
 0x309   :  { %1196 = vmatmul.msk.f32.vlgmr.msra.gmra.mxu3 %vm445_vm5, %v1867_v4 }
 0x30a   :  { %1206 = vmatpush.msk.msrb.mxu3 %vm742_vm7, %v729_v52  ;;  %v987_v52 = vld [vmem:[%s2125_s24 + $0x10] sm:$0xff] }
 0x30c   :  { %863 = vmatpush.msrb.mxu3 %v728_v56  ;;  %v985_v56 = vld [vmem:[%s2125_s24] sm:$0xff] }
 0x30e   :  { %864 = vmatpush.msrb.mxu3 %v727_v58 }
 0x310   :  { %865 = vmatpush.msrb.mxu3 %v726_v53  ;;  %v979_v53 = vmul.f32 0.0625, %v978_v59 }
 0x311   :  { %1197 = vmatmul.msk.f32.gmra.mxu3 %vm445_vm5, %v1886_v8 }
 0x312   :  { %866 = vmatpush.msrb.mxu3 %v725_v54 }
 0x314   :  { %1008 = vmatpush.msra.mxu3 %v999_v32 }
 0x38c   :  { %v711_v61 = vpop.f32.mrf.mxu3 }
 0x38d   :  { %v712_v62 = vadd.f32 %v1235_v60, %v711_v61  ;;  %v981_v61 = vperm.slane %v979_v53, 0 }
 0x38f   :  { %v717_v0 = vmax.f32 %v712_v62, 0.0 }
 0x391   :  { %v723_v1 = vmul.f32 %v1236_v63, %v717_v0  ;;  %1199 = vmatmul.msk.f32.vlgmr.msra.gmra.mxu0 %vm735_vm8, %v717_v0 }
 0x393   :  { %1207 = vmatmul.msk.f32.vlgmr.msrb.gmra.mxu3 %vm735_vm8, %v723_v1 }
 0x394   :  { %v714_v2 = vpop.f32.mrf.mxu3 }
 0x395   :  { %v715_v3 = vadd.f32 %v1235_v60, %v714_v2 }
 0x397   :  { %v718_v5 = vmax.f32 %v715_v3, 0.0 }
 0x399   :  { %v724_v6 = vmul.f32 %v1236_v63, %v718_v5  ;;  %1200 = vmatmul.msk.f32.vlgmr.msrb.gmra.mxu1 %vm735_vm8, %v718_v5 }
 0x39b   :  { %1208 = vmatmul.msk.f32.gmra.mxu3 %vm735_vm8, %v724_v6 }
 0x40e   :  { %v763_v10 = vpop.f32.mrf.mxu0 }
 0x416   :  { %v766_v9 = vpop.f32.mrf.mxu1  ;;  %v868_v54 = vpop.f32.mrf.mxu3 }
 0x417   :  { %787 = vmatpush.msra.mxu1 %v766_v9 }
 0x419   :  { %788 = vmatpush.msra.mxu1 %v763_v10 }
 0x41a   :  { %1201 = vmatmul.msk.f32.vlgmr.msra.gmra.mxu1 %vm445_vm5, %v1867_v4 }
 0x41e   :  { %v871_v1 = vpop.f32.mrf.mxu3 }
 0x422   :  { %1202 = vmatmul.msk.f32.gmra.mxu1 %vm445_vm5, %v1886_v8 }
 0x497   :  { %v790_v19 = vpop.f32.mrf.mxu1 }
 0x498   :  { %v791_v20 = vadd.f32 %v1237_v18, %v790_v19 }
 0x49a   :  { %v796_v22 = vmax.f32 %v791_v20, 0.0 }
 0x49c   :  { %v802_v23 = vmul.f32 %v1238_v21, %v796_v22  ;;  %1210 = vmatmul.msk.f32.vlgmr.msrb.gmra.mxu0 %vm808_vm10, %v796_v22 }
 0x49e   :  { %1204 = vmatmul.msk.f32.vlgmr.msra.gmra.mxu2 %vm808_vm10, %v802_v23 }
 0x49f   :  { %v793_v24 = vpop.f32.mrf.mxu1 }
 0x4a0   :  { %v794_v25 = vadd.f32 %v1237_v18, %v793_v24  ;;  %v1040_v18 = vld [vmem:[%s2126_s25] sm:$0x1] }
 0x4a2   :  { %v797_v26 = vmax.f32 %v794_v25, 0.0 }
 0x4a4   :  { %v803_v27 = vmul.f32 %v1238_v21, %v797_v26  ;;  %1211 = vmatmul.msk.f32.gmra.mxu0 %vm808_vm10, %v797_v26 }
 0x4a6   :  { %1205 = vmatmul.msk.f32.gmra.mxu2 %vm808_vm10, %v803_v27 }
 0x519   :  { %v904_v28 = vpop.f32.mrf.mxu0 }
 0x521   :  { %v907_v29 = vpop.f32.mrf.mxu0  ;;  %v836_v57 = vpop.f32.mrf.mxu2 }
 0x522   :  { %928 = vmatpush.msrb.mxu1 %v907_v29  ;;  %v869_v60 = vadd.f32 %v868_v54, %v836_v57 }
 0x524   :  { %929 = vmatpush.msrb.mxu1 %v904_v28 }
 0x525   :  { %1212 = vmatmul.msk.f32.vlgmr.msrb.gmra.mxu1 %vm445_vm5, %v1867_v4  ;;  %v998_v4 = vld [vmem:[%s2125_s24 + $0x68] sm:$0xff] }
 0x526   :  { %1009 = vmatpush.msra.mxu3 %v998_v4 }
 0x529   :  { %v839_v58 = vpop.f32.mrf.mxu2 }
 0x52a   :  { %v872_v2 = vadd.f32 %v871_v1, %v839_v58 }
 0x52d   :  { %1213 = vmatmul.msk.f32.gmra.mxu1 %vm445_vm5, %v1886_v8  ;;  %v997_v8 = vld [vmem:[%s2125_s24 + $0x60] sm:$0xff] }
 0x52e   :  { %1010 = vmatpush.msra.mxu3 %v997_v8 }
 0x530   :  { %1011 = vmatpush.msra.mxu3 %v996_v33 }
 0x532   :  { %1012 = vmatpush.msra.mxu3 %v995_v34 }
 0x534   :  { %1013 = vmatpush.msra.mxu3 %v994_v35 }
 0x536   :  { %1014 = vmatpush.msra.mxu3 %v993_v36 }
 0x538   :  { %1015 = vmatpush.msra.mxu3 %v992_v37 }
 0x53a   :  { %1016 = vmatpush.msra.mxu3 %v991_v39 }
 0x53c   :  { %1017 = vmatpush.msra.mxu3 %v990_v40 }
 0x53e   :  { %1018 = vmatpush.msra.mxu3 %v989_v44 }
 0x540   :  { %1019 = vmatpush.msra.mxu3 %v988_v46 }
 0x542   :  { %1020 = vmatpush.msra.mxu3 %v987_v52 }
 0x544   :  { %1021 = vmatpush.msra.mxu3 %v986_v55 }
 0x546   :  { %1022 = vmatpush.msra.mxu3 %v985_v56 }
 0x5a2   :  { %v931_v41 = vpop.f32.mrf.mxu1 }
 0x5a3   :  { %v932_v42 = vadd.f32 %v1239_v38, %v931_v41 }
 0x5a5   :  { %v937_v45 = vmax.f32 %v932_v42, 0.0 }
 0x5a7   :  { %v943_v47 = vmul.f32 %v1240_v43, %v937_v45 }
 0x5a9   :  { %1214 = vmatmul.msk.f32.vlgmr.msrb.gmra.mxu2 %vm445_vm5, %v943_v47 }
 0x5aa   :  { %v934_v48 = vpop.f32.mrf.mxu1 }
 0x5ab   :  { %v935_v49 = vadd.f32 %v1239_v38, %v934_v48 }
 0x5ad   :  { %v938_v50 = vmax.f32 %v935_v49, 0.0 }
 0x5af   :  { %v944_v51 = vmul.f32 %v1240_v43, %v938_v50 }
 0x5b1   :  { %1215 = vmatmul.msk.f32.gmra.mxu2 %vm445_vm5, %v944_v51 }
 0x62c   :  { %v970_v62 = vpop.f32.mrf.mxu2 }
 0x62d   :  { %v976_v63 = vadd.f32 %v970_v62, %v869_v60 }
 0x62f   :  { %v983_v0 = vadd.f32 %v981_v61, %v976_v63 }
 0x631   :  { %1216 = vmatmul.msk.f32.vlgmr.msra.gmra.mxu3 %vm1000_vm11, %v983_v0 }
 0x634   :  { %v973_v3 = vpop.f32.mrf.mxu2 }
 0x635   :  { %v977_v5 = vadd.f32 %v973_v3, %v872_v2 }
 0x637   :  { %v984_v6 = vadd.f32 %v981_v61, %v977_v5 }
 0x639   :  { %1217 = vmatmul.msk.f32.gmra.mxu3 %vm1000_vm11, %v984_v6 }
 0x6b4   :  { %v1024_v7 = vpop.f32.mrf.mxu3 }
 0x6b5   :  { %v1031_v10 = vsel %vm1030_vm12, %v1024_v7, 0.0 }
 0x6bc   :  { %v1027_v9 = vpop.f32.mrf.mxu3 }
 0x6bd   :  { %v1032_v11 = vsel %vm1030_vm12, %v1027_v9, 0.0 }
 0x6be   :  { %v1033_v12 = vadd.f32 %v1032_v11, %v1031_v10 }
 0x6c0   :  { %v1034_v13 = vrot.slane %v1033_v12, 4 }
 0x6c2   :  { %v1035_v14 = vadd.f32 %v1034_v13, %v1033_v12 }
 0x6c4   :  { %v1036_v15 = vrot.slane %v1035_v14, 2 }
 0x6c6   :  { %v1037_v16 = vadd.f32 %v1036_v15, %v1035_v14 }
 0x6c8   :  { %v1038_v17 = vrot.slane %v1037_v16, 1 }
 0x6ca   :  { %v1039_v19 = vadd.f32 %v1038_v17, %v1037_v16 }
 0x6cc   :  { %v1041_v20 = vadd.f32 %v1040_v18, %v1039_v19 }
 0x6ce   :  { %1043 = vst.msk [vmem:[#allocation4] sm:$0x1] %vm1042_vm13, %v1041_v20 }
 0x6cf   :  { %1067 = dma.vmem_to_hbm [thread:$0]  %s1063_s12, 16, %s1065_s13, [#allocation5]  }
 0x6d0   :  { %1289 = dma.done.wait [#allocation3], 256  }
 0x6d1   :  { %1290 = vsyncadd [#allocation3], 4294967040 }
 0x6d2   :  { %1291 = dma.done.wait [#allocation5], 16  }
 0x6d3   :  { %1292 = vsyncadd [#allocation5], 4294967280 }
 0x6d4   :  { %1076 = vsyncpa [#allocation3], 1 }
 0x6d5   :  { %1077 = vsyncpa [#allocation5], 1 }

</bundles_post_ra>
